<compile_context>
chip_gen: v6e
topology: v6e:2x2x1
jax: 0.10.0
libtpu: 0.0.40
codegen_flags: <defaults>
</compile_context>

<pallas_src>
import functools

import jax
import jax.numpy as jnp
from jax.experimental import pallas as pl
from jax.experimental.pallas import tpu as pltpu


def _round_up(n, m):
    return (n + m - 1) // m * m


def _cdiv(a, b):
    return -(-a // b)


# rows of the packed row-vector tile
_ROW_MU, _ROW_NEG_INV_SG2, _ROW_B2, _ROW_BFU = 0, 1, 2, 3


def _default_act_dtype():
    """bf16 sigmoids on v6e/v7x (bf16 EUP path); f32 on v5e/older."""
    try:
        kind = jax.devices()[0].device_kind.lower()
    except Exception:
        return jnp.float32
    if ("v6" in kind) or ("v7" in kind) or ("7x" in kind):
        return jnp.bfloat16
    return jnp.float32


def _device_vmem_bytes():
    try:
        return int(pltpu.get_tpu_info().vmem_capacity_bytes)
    except Exception:
        return 64 * (1 << 20)  # conservative (v7x per-core size)


def _ffdn_kernel(x_ref, wx01_ref, b01_ref, rv_ref, w2_ref, wfa_ref, wfb_ref,
                 wo_ref, bo_ref, out_ref, *, act_dtype):
    Dp = w2_ref.shape[0]
    cdt = wx01_ref.dtype                                      # MXU compute dtype (bf16)

    x = x_ref[...]                                            # (TB, D) already bf16

    # [fuzz_in | h1_pre] = x @ [wf | w1] + [bf | b1]  -- single MXU pass over x
    z = jnp.dot(x, wx01_ref[...], preferred_element_type=jnp.float32) + b01_ref[...]
    fuzz_in = z[:, :Dp]                                       # f32
    h1 = jax.nn.sigmoid(z[:, Dp:].astype(act_dtype))

    mu = rv_ref[_ROW_MU:_ROW_MU + 1, :]                       # (1, Dp)
    neg_inv_sg2 = rv_ref[_ROW_NEG_INV_SG2:_ROW_NEG_INV_SG2 + 1, :]
    b2 = rv_ref[_ROW_B2:_ROW_B2 + 1, :]
    bfu = rv_ref[_ROW_BFU:_ROW_BFU + 1, :]

    # Gaussian membership in f32; the fuzzy column mask is folded into wfa's rows.
    d = fuzz_in - mu
    fuzz_out = jnp.exp(d * d * neg_inv_sg2)

    # deep branch (dropout = identity in eval mode)
    h2 = jax.nn.sigmoid(
        (jnp.dot(h1.astype(cdt), w2_ref[...], preferred_element_type=jnp.float32)
         + b2).astype(act_dtype))

    # fusion of cat([fuzz_out, h2]) via split weights; relu after sigmoid is a no-op.
    fused = jax.nn.sigmoid(
        (jnp.dot(fuzz_out.astype(cdt), wfa_ref[...], preferred_element_type=jnp.float32)
         + jnp.dot(h2.astype(cdt), wfb_ref[...], preferred_element_type=jnp.float32)
         + bfu).astype(act_dtype))

    # output layer + lane-dense log-softmax; padded logit lanes carry a -1e30 bias.
    logits = (jnp.dot(fused.astype(cdt), wo_ref[...], preferred_element_type=jnp.float32)
              + bo_ref[...])
    m = jnp.max(logits, axis=1, keepdims=True)
    shifted = logits - m
    lse = jnp.log(jnp.sum(jnp.exp(shifted), axis=1, keepdims=True))
    out_ref[...] = (shifted - lse).astype(out_ref.dtype)


def prep_params(raw, param_dtype=jnp.bfloat16):
    """Pad N-sides to 128 lanes, fuse wf|w1 (K stays = D), fold the fuzzy mask,
    pack row vectors."""
    wf, w1 = raw["wf"], raw["w1"]
    D, F = wf.shape
    C = raw["wo"].shape[1]
    Dp = _round_up(D, 128)
    Cp = _round_up(C, 128)

    def pad2(w, r, c):
        return jnp.pad(w, ((0, r - w.shape[0]), (0, c - w.shape[1])))

    def pad_cols(w, c):
        return jnp.pad(w, ((0, 0), (0, c - w.shape[1])))

    def pad1(v, n):
        return jnp.pad(v, (0, n - v.shape[0]))

    # x is NOT lane-padded; w_x01 keeps K = D and pads only its output side.
    wf_p = pad_cols(wf, Dp)                                   # (D, F)  -> (D, Dp)
    w1_p = pad_cols(w1, Dp)                                   # (D, D)  -> (D, Dp)
    w_x01 = jnp.concatenate([wf_p, w1_p], axis=1).astype(param_dtype)   # (D, 2Dp)
    b01 = jnp.concatenate([pad1(raw["bf"], Dp),
                           pad1(raw["b1"], Dp)])[None, :].astype(jnp.float32)

    rowvec = jnp.zeros((8, Dp), jnp.float32)
    rowvec = rowvec.at[_ROW_MU].set(pad1(raw["mu"], Dp))
    rowvec = rowvec.at[_ROW_NEG_INV_SG2].set(pad1(-1.0 / (raw["sigma"] ** 2), Dp))
    rowvec = rowvec.at[_ROW_B2].set(pad1(raw["b2"], Dp))
    rowvec = rowvec.at[_ROW_BFU].set(pad1(raw["bfu"], Dp))

    w2_p = pad2(raw["w2"], Dp, Dp).astype(param_dtype)

    wfu = raw["wfu"]                                          # (2D, D)
    wfa, wfb = wfu[:D, :], wfu[D:, :]
    # fold the fuzzy column mask: (fuzz*mask)@wfa == fuzz@(diag(mask)@wfa); also
    # kills the exp(0)=1 values produced in the padded / j>=F columns.
    col_mask = (jnp.arange(D) < F).astype(wfa.dtype)[:, None]
    wfa_p = pad2(wfa * col_mask, Dp, Dp).astype(param_dtype)
    wfb_p = pad2(wfb, Dp, Dp).astype(param_dtype)

    wo_p = pad2(raw["wo"], Dp, Cp).astype(param_dtype)
    bo_p = pad1(raw["bo"], Cp)
    bo_p = jnp.where(jnp.arange(Cp) < C, bo_p, -1e30)[None, :].astype(jnp.float32)

    return dict(w_x01=w_x01, b01=b01, rowvec=rowvec, w2=w2_p, wfa=wfa_p,
                wfb=wfb_p, wo=wo_p, bo=bo_p, D=D, C=C, Dp=Dp, Cp=Cp)


def fused_fuzzy_deep_net(x, p, tile_b=None, act_dtype=None):
    """x: (B, D) float32; p: output of prep_params. Returns (B, num_class) log-probs."""
    B, D = x.shape
    assert D == p["D"]
    Dp, Cp, C = p["Dp"], p["Cp"], p["C"]
    if act_dtype is None:
        act_dtype = _default_act_dtype()

    # tile_b: minimize batch padding and aim for >=2 grid steps (v7x megacore).
    if tile_b is None:
        target = 512
        n_tiles = max(1, _cdiv(B, target))
        if n_tiles < 2 and B > 16:
            n_tiles = 2
        tile_b = _round_up(_cdiv(B, n_tiles), 8)
    tile_b = max(8, _round_up(int(tile_b), 8))
    Bp = _round_up(B, tile_b)
    n_steps = Bp // tile_b

    # stream x in bf16, batch-pad only (no lane padding).
    xp = jnp.pad(x, ((0, Bp - B), (0, 0))).astype(jnp.bfloat16)

    weight_args = (p["w_x01"], p["b01"], p["rowvec"], p["w2"],
                   p["wfa"], p["wfb"], p["wo"], p["bo"])
    const_map = lambda i: (0, 0)                              # VMEM-resident across steps

    kernel = functools.partial(_ffdn_kernel, act_dtype=act_dtype)

    def vmem_budget(weights_single_buffered, x_bufs):
        weight_bytes = sum(int(w.size) * w.dtype.itemsize for w in weight_args)
        wb = (1 if weights_single_buffered else 2) * weight_bytes
        x_bytes = x_bufs * tile_b * D * 2
        out_bytes = 2 * tile_b * Cp * 4
        inter_bytes = tile_b * (2 * Dp + 6 * Dp + 2 * Cp) * 4  # z, h1, d, fuzz, h2, fused, logits
        return wb + x_bytes + out_bytes + inter_bytes + (4 << 20)

    device_vmem = _device_vmem_bytes()

    def run(use_pipeline_mode):
        if use_pipeline_mode:
            x_bufs = 3 if n_steps >= 3 else 2
            if x_bufs == 3:
                x_spec = pl.BlockSpec((tile_b, D), lambda i: (i, 0),
                                      pipeline_mode=pl.Buffered(3))
            else:
                x_spec = pl.BlockSpec((tile_b, D), lambda i: (i, 0))
            weight_specs = [pl.BlockSpec(w.shape, const_map,
                                         pipeline_mode=pl.Buffered(1))
                            for w in weight_args]
            budget = vmem_budget(True, x_bufs)
        else:
            x_spec = pl.BlockSpec((tile_b, D), lambda i: (i, 0))
            weight_specs = [pl.BlockSpec(w.shape, const_map) for w in weight_args]
            budget = vmem_budget(False, 2)

        vmem_limit = int(min(device_vmem - (2 << 20), max(32 << 20, budget)))

        return pl.pallas_call(
            kernel,
            out_shape=jax.ShapeDtypeStruct((Bp, Cp), jnp.float32),
            grid=(n_steps,),
            in_specs=[x_spec] + weight_specs,
            out_specs=pl.BlockSpec((tile_b, Cp), lambda i: (i, 0)),
            compiler_params=pltpu.CompilerParams(
                dimension_semantics=("parallel",),
                vmem_limit_bytes=vmem_limit),
        )(xp, *weight_args)

    try:
        out = run(use_pipeline_mode=True)
    except Exception:
        # fallback if pipeline_mode=pl.Buffered(...) is not supported here
        out = run(use_pipeline_mode=False)
    return out[:B, :C]


def make_raw_params(key, input_vector_size, fuzz_vector_size, num_class):
    """Deterministic synthetic parameters (nn.Linear-style uniform init)."""
    D, F, C = input_vector_size, fuzz_vector_size, num_class
    ks = jax.random.split(key, 12)

    def linear(kw, kb, fan_in, fan_out):
        bound = 1.0 / jnp.sqrt(jnp.float32(fan_in))
        w = jax.random.uniform(kw, (fan_in, fan_out), jnp.float32, -bound, bound)
        b = jax.random.uniform(kb, (fan_out,), jnp.float32, -bound, bound)
        return w, b

    wf, bf = linear(ks[0], ks[1], D, F)
    mu = jax.random.normal(ks[2], (F,), jnp.float32)
    sigma = 0.5 + 0.5 * jax.random.uniform(ks[3], (F,), jnp.float32)   # in (0.5, 1.0)
    w1, b1 = linear(ks[4], ks[5], D, D)
    w2, b2 = linear(ks[6], ks[7], D, D)
    wfu, bfu = linear(ks[8], ks[9], 2 * D, D)
    wo, bo = linear(ks[10], ks[11], D, C)
    return dict(wf=wf, bf=bf, mu=mu, sigma=sigma, w1=w1, b1=b1, w2=w2, b2=b2,
                wfu=wfu, bfu=bfu, wo=wo, bo=bo)


def reference_forward_f32(x, raw):
    """PyTorch-module-equivalent math in f32 (eval-mode dropout)."""
    B, D = x.shape
    F = raw["wf"].shape[1]
    fuzz_in = x @ raw["wf"] + raw["bf"]
    fuzz_cols = jnp.exp(-((fuzz_in - raw["mu"]) ** 2) / (raw["sigma"] ** 2))
    fuzz_out = jnp.zeros((B, D), jnp.float32).at[:, :F].set(fuzz_cols)
    h1 = jax.nn.sigmoid(x @ raw["w1"] + raw["b1"])
    h2 = jax.nn.sigmoid(h1 @ raw["w2"] + raw["b2"])
    cat = jnp.concatenate([fuzz_out, h2], axis=1)
    fused = jnp.maximum(jax.nn.sigmoid(cat @ raw["wfu"] + raw["bfu"]), 0.0)
    logits = fused @ raw["wo"] + raw["bo"]
    return jax.nn.log_softmax(logits, axis=1)


def reference_forward_mirror(x, p, act_dtype=None):
    """Pure-JAX mirror of the kernel math (padded N sides, bf16 weights/x)."""
    if act_dtype is None:
        act_dtype = _default_act_dtype()
    Dp = p["Dp"]
    cdt = p["w_x01"].dtype
    xb = x.astype(jnp.bfloat16)
    z = jnp.dot(xb, p["w_x01"], preferred_element_type=jnp.float32) + p["b01"]
    fuzz_in = z[:, :Dp]
    h1 = jax.nn.sigmoid(z[:, Dp:].astype(act_dtype))
    rv = p["rowvec"]
    mu = rv[_ROW_MU:_ROW_MU + 1]
    nis = rv[_ROW_NEG_INV_SG2:_ROW_NEG_INV_SG2 + 1]
    b2 = rv[_ROW_B2:_ROW_B2 + 1]
    bfu = rv[_ROW_BFU:_ROW_BFU + 1]
    d = fuzz_in - mu
    fuzz = jnp.exp(d * d * nis)
    h2 = jax.nn.sigmoid(
        (jnp.dot(h1.astype(cdt), p["w2"], preferred_element_type=jnp.float32)
         + b2).astype(act_dtype))
    fused = jax.nn.sigmoid(
        (jnp.dot(fuzz.astype(cdt), p["wfa"], preferred_element_type=jnp.float32)
         + jnp.dot(h2.astype(cdt), p["wfb"], preferred_element_type=jnp.float32)
         + bfu).astype(act_dtype))
    logits = (jnp.dot(fused.astype(cdt), p["wo"], preferred_element_type=jnp.float32)
              + p["bo"])
    return jax.nn.log_softmax(logits, axis=1)[:, :p["C"]]


if __name__ == "__main__":
    # small shapes consistent with the module: batch=8, input_vector_size=16,
    # fuzz_vector_size=16, num_class=8
    B, D, F, C = 8, 16, 16, 8
    key = jax.random.PRNGKey(0)
    k_x, k_p = jax.random.split(key)
    x = jax.random.normal(k_x, (B, D), jnp.float32)
    raw = make_raw_params(k_p, D, F, C)
    params = prep_params(raw, param_dtype=jnp.bfloat16)
    act_dtype = _default_act_dtype()

    out = fused_fuzzy_deep_net(x, params, act_dtype=act_dtype)
    out = jax.block_until_ready(out)
    assert out.shape == (B, C)
    assert bool(jnp.all(jnp.isfinite(out))), "non-finite log-probs"

    mirror = reference_forward_mirror(x, params, act_dtype=act_dtype)  # same bf16/padded math
    ref32 = reference_forward_f32(x, raw)                              # original f32 semantics
    assert jnp.allclose(out, mirror, atol=1e-2, rtol=1e-2), "mismatch vs bf16 mirror"
    assert jnp.allclose(out, ref32, atol=1e-1, rtol=5e-2), "mismatch vs f32 model reference"
    print("KERNEL_OK")
</pallas_src>

<mosaic_0001>
module attributes {stable_mosaic.version = 11 : i64} {
  func.func @_ffdn_kernel(%arg0: i32, %arg1: memref<8x16xbf16, #tpu.memory_space<vmem>>, %arg2: memref<16x256xbf16, #tpu.memory_space<vmem>>, %arg3: memref<1x256xf32, #tpu.memory_space<vmem>>, %arg4: memref<8x128xf32, #tpu.memory_space<vmem>>, %arg5: memref<128x128xbf16, #tpu.memory_space<vmem>>, %arg6: memref<128x128xbf16, #tpu.memory_space<vmem>>, %arg7: memref<128x128xbf16, #tpu.memory_space<vmem>>, %arg8: memref<128x128xbf16, #tpu.memory_space<vmem>>, %arg9: memref<1x128xf32, #tpu.memory_space<vmem>>, %arg10: memref<8x128xf32, #tpu.memory_space<vmem>>) attributes {dimension_semantics = [#tpu.dimension_semantics<parallel>], iteration_bounds = array<i64: 1>, scalar_prefetch = 0 : i64, scratch_operands = 0 : i64, tpu.core_type = #tpu.core_type<tc>, window_params = [{transform_indices = @transform_0, window_bounds = array<i64: 8, 16>}, {pipeline_mode = #tpu.pipeline_mode<synchronous>, transform_indices = @transform_1, window_bounds = array<i64: 16, 256>}, {pipeline_mode = #tpu.pipeline_mode<synchronous>, transform_indices = @transform_2, window_bounds = array<i64: 1, 256>}, {pipeline_mode = #tpu.pipeline_mode<synchronous>, transform_indices = @transform_3, window_bounds = array<i64: 8, 128>}, {pipeline_mode = #tpu.pipeline_mode<synchronous>, transform_indices = @transform_4, window_bounds = array<i64: 128, 128>}, {pipeline_mode = #tpu.pipeline_mode<synchronous>, transform_indices = @transform_5, window_bounds = array<i64: 128, 128>}, {pipeline_mode = #tpu.pipeline_mode<synchronous>, transform_indices = @transform_6, window_bounds = array<i64: 128, 128>}, {pipeline_mode = #tpu.pipeline_mode<synchronous>, transform_indices = @transform_7, window_bounds = array<i64: 128, 128>}, {pipeline_mode = #tpu.pipeline_mode<synchronous>, transform_indices = @transform_8, window_bounds = array<i64: 1, 128>}, {transform_indices = @transform_9, window_bounds = array<i64: 8, 128>}]} {
    %c0 = arith.constant 0 : index
    %c0_0 = arith.constant 0 : index
    %0 = vector.load %arg1[%c0, %c0_0] : memref<8x16xbf16, #tpu.memory_space<vmem>>, vector<8x16xbf16>
    %c0_1 = arith.constant 0 : index
    %c0_2 = arith.constant 0 : index
    %1 = vector.load %arg2[%c0_1, %c0_2] : memref<16x256xbf16, #tpu.memory_space<vmem>>, vector<16x256xbf16>
    %cst = arith.constant dense<0.000000e+00> : vector<8x256xf32>
    %2 = tpu.matmul %0, %1, %cst {dimension_numbers = #tpu.dot_dimension_numbers<[1], [0], [0], [1], [0, 0, 1, 1], [], []>} : vector<8x16xbf16>, vector<16x256xbf16>, vector<8x256xf32> -> vector<8x256xf32>
    %c0_3 = arith.constant 0 : index
    %c0_4 = arith.constant 0 : index
    %3 = vector.load %arg3[%c0_3, %c0_4] : memref<1x256xf32, #tpu.memory_space<vmem>>, vector<1x256xf32>
    %4 = vector.broadcast %3 : vector<1x256xf32> to vector<8x256xf32>
    %5 = arith.addf %2, %4 : vector<8x256xf32>
    %6 = vector.extract_strided_slice %5 {offsets = [0, 0], sizes = [8, 128], strides = [1, 1]} : vector<8x256xf32> to vector<8x128xf32>
    %7 = vector.extract_strided_slice %5 {offsets = [0, 128], sizes = [8, 128], strides = [1, 1]} : vector<8x256xf32> to vector<8x128xf32>
    %8 = arith.negf %7 : vector<8x128xf32>
    %9 = math.exp %8 : vector<8x128xf32>
    %cst_5 = arith.constant 1.000000e+00 : f32
    %10 = vector.broadcast %cst_5 : f32 to vector<8x128xf32>
    %11 = arith.addf %10, %9 : vector<8x128xf32>
    %12 = arith.divf %10, %11 : vector<8x128xf32>
    %c0_6 = arith.constant 0 : index
    %c0_7 = arith.constant 0 : index
    %13 = vector.load %arg4[%c0_6, %c0_7] : memref<8x128xf32, #tpu.memory_space<vmem>>, vector<1x128xf32>
    %c1 = arith.constant 1 : index
    %c0_8 = arith.constant 0 : index
    %14 = vector.load %arg4[%c1, %c0_8] : memref<8x128xf32, #tpu.memory_space<vmem>>, vector<1x128xf32>
    %c2 = arith.constant 2 : index
    %c0_9 = arith.constant 0 : index
    %15 = vector.load %arg4[%c2, %c0_9] : memref<8x128xf32, #tpu.memory_space<vmem>>, vector<1x128xf32>
    %c3 = arith.constant 3 : index
    %c0_10 = arith.constant 0 : index
    %16 = vector.load %arg4[%c3, %c0_10] : memref<8x128xf32, #tpu.memory_space<vmem>>, vector<1x128xf32>
    %17 = vector.broadcast %13 : vector<1x128xf32> to vector<8x128xf32>
    %18 = arith.subf %6, %17 : vector<8x128xf32>
    %19 = arith.mulf %18, %18 : vector<8x128xf32>
    %20 = vector.broadcast %14 : vector<1x128xf32> to vector<8x128xf32>
    %21 = arith.mulf %19, %20 : vector<8x128xf32>
    %22 = math.exp %21 : vector<8x128xf32>
    %23 = arith.truncf %12 : vector<8x128xf32> to vector<8x128xbf16>
    %c0_11 = arith.constant 0 : index
    %c0_12 = arith.constant 0 : index
    %24 = vector.load %arg5[%c0_11, %c0_12] : memref<128x128xbf16, #tpu.memory_space<vmem>>, vector<128x128xbf16>
    %cst_13 = arith.constant dense<0.000000e+00> : vector<8x128xf32>
    %25 = tpu.matmul %23, %24, %cst_13 {dimension_numbers = #tpu.dot_dimension_numbers<[1], [0], [0], [1], [0, 0, 1, 1], [], []>} : vector<8x128xbf16>, vector<128x128xbf16>, vector<8x128xf32> -> vector<8x128xf32>
    %26 = vector.broadcast %15 : vector<1x128xf32> to vector<8x128xf32>
    %27 = arith.addf %25, %26 : vector<8x128xf32>
    %28 = arith.negf %27 : vector<8x128xf32>
    %29 = math.exp %28 : vector<8x128xf32>
    %cst_14 = arith.constant 1.000000e+00 : f32
    %30 = vector.broadcast %cst_14 : f32 to vector<8x128xf32>
    %31 = arith.addf %30, %29 : vector<8x128xf32>
    %32 = arith.divf %30, %31 : vector<8x128xf32>
    %33 = arith.truncf %22 : vector<8x128xf32> to vector<8x128xbf16>
    %c0_15 = arith.constant 0 : index
    %c0_16 = arith.constant 0 : index
    %34 = vector.load %arg6[%c0_15, %c0_16] : memref<128x128xbf16, #tpu.memory_space<vmem>>, vector<128x128xbf16>
    %cst_17 = arith.constant dense<0.000000e+00> : vector<8x128xf32>
    %35 = tpu.matmul %33, %34, %cst_17 {dimension_numbers = #tpu.dot_dimension_numbers<[1], [0], [0], [1], [0, 0, 1, 1], [], []>} : vector<8x128xbf16>, vector<128x128xbf16>, vector<8x128xf32> -> vector<8x128xf32>
    %36 = arith.truncf %32 : vector<8x128xf32> to vector<8x128xbf16>
    %c0_18 = arith.constant 0 : index
    %c0_19 = arith.constant 0 : index
    %37 = vector.load %arg7[%c0_18, %c0_19] : memref<128x128xbf16, #tpu.memory_space<vmem>>, vector<128x128xbf16>
    %cst_20 = arith.constant dense<0.000000e+00> : vector<8x128xf32>
    %38 = tpu.matmul %36, %37, %cst_20 {dimension_numbers = #tpu.dot_dimension_numbers<[1], [0], [0], [1], [0, 0, 1, 1], [], []>} : vector<8x128xbf16>, vector<128x128xbf16>, vector<8x128xf32> -> vector<8x128xf32>
    %39 = arith.addf %35, %38 : vector<8x128xf32>
    %40 = vector.broadcast %16 : vector<1x128xf32> to vector<8x128xf32>
    %41 = arith.addf %39, %40 : vector<8x128xf32>
    %42 = arith.negf %41 : vector<8x128xf32>
    %43 = math.exp %42 : vector<8x128xf32>
    %cst_21 = arith.constant 1.000000e+00 : f32
    %44 = vector.broadcast %cst_21 : f32 to vector<8x128xf32>
    %45 = arith.addf %44, %43 : vector<8x128xf32>
    %46 = arith.divf %44, %45 : vector<8x128xf32>
    %47 = arith.truncf %46 : vector<8x128xf32> to vector<8x128xbf16>
    %c0_22 = arith.constant 0 : index
    %c0_23 = arith.constant 0 : index
    %48 = vector.load %arg8[%c0_22, %c0_23] : memref<128x128xbf16, #tpu.memory_space<vmem>>, vector<128x128xbf16>
    %cst_24 = arith.constant dense<0.000000e+00> : vector<8x128xf32>
    %49 = tpu.matmul %47, %48, %cst_24 {dimension_numbers = #tpu.dot_dimension_numbers<[1], [0], [0], [1], [0, 0, 1, 1], [], []>} : vector<8x128xbf16>, vector<128x128xbf16>, vector<8x128xf32> -> vector<8x128xf32>
    %c0_25 = arith.constant 0 : index
    %c0_26 = arith.constant 0 : index
    %50 = vector.load %arg9[%c0_25, %c0_26] : memref<1x128xf32, #tpu.memory_space<vmem>>, vector<1x128xf32>
    %51 = vector.broadcast %50 : vector<1x128xf32> to vector<8x128xf32>
    %52 = arith.addf %49, %51 : vector<8x128xf32>
    %cst_27 = arith.constant dense<0xFF800000> : vector<8xf32>
    %53 = vector.multi_reduction <maximumf>, %52, %cst_27 [1] : vector<8x128xf32> to vector<8xf32>
    %54 = vector.shape_cast %53 : vector<8xf32> to vector<8x1xf32>
    %55 = vector.broadcast %54 : vector<8x1xf32> to vector<8x128xf32>
    %56 = arith.subf %52, %55 : vector<8x128xf32>
    %57 = math.exp %56 : vector<8x128xf32>
    %cst_28 = arith.constant dense<0.000000e+00> : vector<8xf32>
    %58 = vector.multi_reduction <add>, %57, %cst_28 [1] : vector<8x128xf32> to vector<8xf32>
    %59 = vector.shape_cast %58 : vector<8xf32> to vector<8x1xf32>
    %60 = math.log %59 : vector<8x1xf32>
    %61 = vector.broadcast %60 : vector<8x1xf32> to vector<8x128xf32>
    %62 = arith.subf %56, %61 : vector<8x128xf32>
    %c0_29 = arith.constant 0 : index
    %c0_30 = arith.constant 0 : index
    %63 = vector.load %arg10[%c0_29, %c0_30] : memref<8x128xf32, #tpu.memory_space<vmem>>, vector<8x128xf32>
    tpu.vector_store %arg10[%c0_29, %c0_30], %62 {strides = array<i32>} : memref<8x128xf32, #tpu.memory_space<vmem>>, vector<8x128xf32>,
    return
  }
  func.func @transform_0(%arg0: i32) -> (i32, i32) {
    %c0_i32 = arith.constant 0 : i32
    %c0_i32_0 = arith.constant 0 : i32
    return %arg0, %c0_i32 : i32, i32
  }
  func.func @transform_1(%arg0: i32) -> (i32, i32) {
    %c0_i32 = arith.constant 0 : i32
    %c0_i32_0 = arith.constant 0 : i32
    %c0_i32_1 = arith.constant 0 : i32
    return %c0_i32, %c0_i32_0 : i32, i32
  }
  func.func @transform_2(%arg0: i32) -> (i32, i32) {
    %c0_i32 = arith.constant 0 : i32
    %c0_i32_0 = arith.constant 0 : i32
    %c0_i32_1 = arith.constant 0 : i32
    return %c0_i32, %c0_i32_0 : i32, i32
  }
  func.func @transform_3(%arg0: i32) -> (i32, i32) {
    %c0_i32 = arith.constant 0 : i32
    %c0_i32_0 = arith.constant 0 : i32
    %c0_i32_1 = arith.constant 0 : i32
    return %c0_i32, %c0_i32_0 : i32, i32
  }
  func.func @transform_4(%arg0: i32) -> (i32, i32) {
    %c0_i32 = arith.constant 0 : i32
    %c0_i32_0 = arith.constant 0 : i32
    %c0_i32_1 = arith.constant 0 : i32
    return %c0_i32, %c0_i32_0 : i32, i32
  }
  func.func @transform_5(%arg0: i32) -> (i32, i32) {
    %c0_i32 = arith.constant 0 : i32
    %c0_i32_0 = arith.constant 0 : i32
    %c0_i32_1 = arith.constant 0 : i32
    return %c0_i32, %c0_i32_0 : i32, i32
  }
  func.func @transform_6(%arg0: i32) -> (i32, i32) {
    %c0_i32 = arith.constant 0 : i32
    %c0_i32_0 = arith.constant 0 : i32
    %c0_i32_1 = arith.constant 0 : i32
    return %c0_i32, %c0_i32_0 : i32, i32
  }
  func.func @transform_7(%arg0: i32) -> (i32, i32) {
    %c0_i32 = arith.constant 0 : i32
    %c0_i32_0 = arith.constant 0 : i32
    %c0_i32_1 = arith.constant 0 : i32
    return %c0_i32, %c0_i32_0 : i32, i32
  }
  func.func @transform_8(%arg0: i32) -> (i32, i32) {
    %c0_i32 = arith.constant 0 : i32
    %c0_i32_0 = arith.constant 0 : i32
    %c0_i32_1 = arith.constant 0 : i32
    return %c0_i32, %c0_i32_0 : i32, i32
  }
  func.func @transform_9(%arg0: i32) -> (i32, i32) {
    %c0_i32 = arith.constant 0 : i32
    %c0_i32_0 = arith.constant 0 : i32
    return %arg0, %c0_i32 : i32, i32
  }
}

module attributes {stable_mosaic.version = 11 : i64} {
  func.func @_ffdn_kernel(%arg0: i32, %arg1: memref<8x16xbf16, #tpu.memory_space<vmem>>, %arg2: memref<16x256xbf16, #tpu.memory_space<vmem>>, %arg3: memref<1x256xf32, #tpu.memory_space<vmem>>, %arg4: memref<8x128xf32, #tpu.memory_space<vmem>>, %arg5: memref<128x128xbf16, #tpu.memory_space<vmem>>, %arg6: memref<128x128xbf16, #tpu.memory_space<vmem>>, %arg7: memref<128x128xbf16, #tpu.memory_space<vmem>>, %arg8: memref<128x128xbf16, #tpu.memory_space<vmem>>, %arg9: memref<1x128xf32, #tpu.memory_space<vmem>>, %arg10: memref<8x128xf32, #tpu.memory_space<vmem>>) attributes {dimension_semantics = [#tpu.dimension_semantics<parallel>], iteration_bounds = array<i64: 1>, scalar_prefetch = 0 : i64, scratch_operands = 0 : i64, tpu.core_type = #tpu.core_type<tc>, window_params = [{transform_indices = @transform_0, window_bounds = array<i64: 8, 16>}, {pipeline_mode = #tpu.pipeline_mode<synchronous>, transform_indices = @transform_1, window_bounds = array<i64: 16, 256>}, {pipeline_mode = #tpu.pipeline_mode<synchronous>, transform_indices = @transform_2, window_bounds = array<i64: 1, 256>}, {pipeline_mode = #tpu.pipeline_mode<synchronous>, transform_indices = @transform_3, window_bounds = array<i64: 8, 128>}, {pipeline_mode = #tpu.pipeline_mode<synchronous>, transform_indices = @transform_4, window_bounds = array<i64: 128, 128>}, {pipeline_mode = #tpu.pipeline_mode<synchronous>, transform_indices = @transform_5, window_bounds = array<i64: 128, 128>}, {pipeline_mode = #tpu.pipeline_mode<synchronous>, transform_indices = @transform_6, window_bounds = array<i64: 128, 128>}, {pipeline_mode = #tpu.pipeline_mode<synchronous>, transform_indices = @transform_7, window_bounds = array<i64: 128, 128>}, {pipeline_mode = #tpu.pipeline_mode<synchronous>, transform_indices = @transform_8, window_bounds = array<i64: 1, 128>}, {transform_indices = @transform_9, window_bounds = array<i64: 8, 128>}]} {
    %c0 = arith.constant 0 : index
    %c0_0 = arith.constant 0 : index
    %0 = vector.load %arg1[%c0, %c0_0] : memref<8x16xbf16, #tpu.memory_space<vmem>>, vector<8x16xbf16>
    %c0_1 = arith.constant 0 : index
    %c0_2 = arith.constant 0 : index
    %1 = vector.load %arg2[%c0_1, %c0_2] : memref<16x256xbf16, #tpu.memory_space<vmem>>, vector<16x256xbf16>
    %cst = arith.constant dense<0.000000e+00> : vector<8x256xf32>
    %2 = tpu.matmul %0, %1, %cst {dimension_numbers = #tpu.dot_dimension_numbers<[1], [0], [0], [1], [0, 0, 1, 1], [], []>} : vector<8x16xbf16>, vector<16x256xbf16>, vector<8x256xf32> -> vector<8x256xf32>
    %c0_3 = arith.constant 0 : index
    %c0_4 = arith.constant 0 : index
    %3 = vector.load %arg3[%c0_3, %c0_4] : memref<1x256xf32, #tpu.memory_space<vmem>>, vector<1x256xf32>
    %4 = vector.broadcast %3 : vector<1x256xf32> to vector<8x256xf32>
    %5 = arith.addf %2, %4 : vector<8x256xf32>
    %6 = vector.extract_strided_slice %5 {offsets = [0, 0], sizes = [8, 128], strides = [1, 1]} : vector<8x256xf32> to vector<8x128xf32>
    %7 = vector.extract_strided_slice %5 {offsets = [0, 128], sizes = [8, 128], strides = [1, 1]} : vector<8x256xf32> to vector<8x128xf32>
    %8 = arith.negf %7 : vector<8x128xf32>
    %9 = math.exp %8 : vector<8x128xf32>
    %cst_5 = arith.constant 1.000000e+00 : f32
    %10 = vector.broadcast %cst_5 : f32 to vector<8x128xf32>
    %11 = arith.addf %10, %9 : vector<8x128xf32>
    %12 = arith.divf %10, %11 : vector<8x128xf32>
    %c0_6 = arith.constant 0 : index
    %c0_7 = arith.constant 0 : index
    %13 = vector.load %arg4[%c0_6, %c0_7] : memref<8x128xf32, #tpu.memory_space<vmem>>, vector<1x128xf32>
    %c1 = arith.constant 1 : index
    %c0_8 = arith.constant 0 : index
    %14 = vector.load %arg4[%c1, %c0_8] : memref<8x128xf32, #tpu.memory_space<vmem>>, vector<1x128xf32>
    %c2 = arith.constant 2 : index
    %c0_9 = arith.constant 0 : index
    %15 = vector.load %arg4[%c2, %c0_9] : memref<8x128xf32, #tpu.memory_space<vmem>>, vector<1x128xf32>
    %c3 = arith.constant 3 : index
    %c0_10 = arith.constant 0 : index
    %16 = vector.load %arg4[%c3, %c0_10] : memref<8x128xf32, #tpu.memory_space<vmem>>, vector<1x128xf32>
    %17 = vector.broadcast %13 : vector<1x128xf32> to vector<8x128xf32>
    %18 = arith.subf %6, %17 : vector<8x128xf32>
    %19 = arith.mulf %18, %18 : vector<8x128xf32>
    %20 = vector.broadcast %14 : vector<1x128xf32> to vector<8x128xf32>
    %21 = arith.mulf %19, %20 : vector<8x128xf32>
    %22 = math.exp %21 : vector<8x128xf32>
    %23 = arith.truncf %12 : vector<8x128xf32> to vector<8x128xbf16>
    %c0_11 = arith.constant 0 : index
    %c0_12 = arith.constant 0 : index
    %24 = vector.load %arg5[%c0_11, %c0_12] : memref<128x128xbf16, #tpu.memory_space<vmem>>, vector<128x128xbf16>
    %cst_13 = arith.constant dense<0.000000e+00> : vector<8x128xf32>
    %25 = tpu.matmul %23, %24, %cst_13 {dimension_numbers = #tpu.dot_dimension_numbers<[1], [0], [0], [1], [0, 0, 1, 1], [], []>} : vector<8x128xbf16>, vector<128x128xbf16>, vector<8x128xf32> -> vector<8x128xf32>
    %26 = vector.broadcast %15 : vector<1x128xf32> to vector<8x128xf32>
    %27 = arith.addf %25, %26 : vector<8x128xf32>
    %28 = arith.negf %27 : vector<8x128xf32>
    %29 = math.exp %28 : vector<8x128xf32>
    %cst_14 = arith.constant 1.000000e+00 : f32
    %30 = vector.broadcast %cst_14 : f32 to vector<8x128xf32>
    %31 = arith.addf %30, %29 : vector<8x128xf32>
    %32 = arith.divf %30, %31 : vector<8x128xf32>
    %33 = arith.truncf %22 : vector<8x128xf32> to vector<8x128xbf16>
    %c0_15 = arith.constant 0 : index
    %c0_16 = arith.constant 0 : index
    %34 = vector.load %arg6[%c0_15, %c0_16] : memref<128x128xbf16, #tpu.memory_space<vmem>>, vector<128x128xbf16>
    %cst_17 = arith.constant dense<0.000000e+00> : vector<8x128xf32>
    %35 = tpu.matmul %33, %34, %cst_17 {dimension_numbers = #tpu.dot_dimension_numbers<[1], [0], [0], [1], [0, 0, 1, 1], [], []>} : vector<8x128xbf16>, vector<128x128xbf16>, vector<8x128xf32> -> vector<8x128xf32>
    %36 = arith.truncf %32 : vector<8x128xf32> to vector<8x128xbf16>
    %c0_18 = arith.constant 0 : index
    %c0_19 = arith.constant 0 : index
    %37 = vector.load %arg7[%c0_18, %c0_19] : memref<128x128xbf16, #tpu.memory_space<vmem>>, vector<128x128xbf16>
    %cst_20 = arith.constant dense<0.000000e+00> : vector<8x128xf32>
    %38 = tpu.matmul %36, %37, %cst_20 {dimension_numbers = #tpu.dot_dimension_numbers<[1], [0], [0], [1], [0, 0, 1, 1], [], []>} : vector<8x128xbf16>, vector<128x128xbf16>, vector<8x128xf32> -> vector<8x128xf32>
    %39 = arith.addf %35, %38 : vector<8x128xf32>
    %40 = vector.broadcast %16 : vector<1x128xf32> to vector<8x128xf32>
    %41 = arith.addf %39, %40 : vector<8x128xf32>
    %42 = arith.negf %41 : vector<8x128xf32>
    %43 = math.exp %42 : vector<8x128xf32>
    %cst_21 = arith.constant 1.000000e+00 : f32
    %44 = vector.broadcast %cst_21 : f32 to vector<8x128xf32>
    %45 = arith.addf %44, %43 : vector<8x128xf32>
    %46 = arith.divf %44, %45 : vector<8x128xf32>
    %47 = arith.truncf %46 : vector<8x128xf32> to vector<8x128xbf16>
    %c0_22 = arith.constant 0 : index
    %c0_23 = arith.constant 0 : index
    %48 = vector.load %arg8[%c0_22, %c0_23] : memref<128x128xbf16, #tpu.memory_space<vmem>>, vector<128x128xbf16>
    %cst_24 = arith.constant dense<0.000000e+00> : vector<8x128xf32>
    %49 = tpu.matmul %47, %48, %cst_24 {dimension_numbers = #tpu.dot_dimension_numbers<[1], [0], [0], [1], [0, 0, 1, 1], [], []>} : vector<8x128xbf16>, vector<128x128xbf16>, vector<8x128xf32> -> vector<8x128xf32>
    %c0_25 = arith.constant 0 : index
    %c0_26 = arith.constant 0 : index
    %50 = vector.load %arg9[%c0_25, %c0_26] : memref<1x128xf32, #tpu.memory_space<vmem>>, vector<1x128xf32>
    %51 = vector.broadcast %50 : vector<1x128xf32> to vector<8x128xf32>
    %52 = arith.addf %49, %51 : vector<8x128xf32>
    %cst_27 = arith.constant dense<0xFF800000> : vector<8xf32>
    %53 = vector.multi_reduction <maximumf>, %52, %cst_27 [1] : vector<8x128xf32> to vector<8xf32>
    %54 = vector.shape_cast %53 : vector<8xf32> to vector<8x1xf32>
    %55 = vector.broadcast %54 : vector<8x1xf32> to vector<8x128xf32>
    %56 = arith.subf %52, %55 : vector<8x128xf32>
    %57 = math.exp %56 : vector<8x128xf32>
    %cst_28 = arith.constant dense<0.000000e+00> : vector<8xf32>
    %58 = vector.multi_reduction <add>, %57, %cst_28 [1] : vector<8x128xf32> to vector<8xf32>
    %59 = vector.shape_cast %58 : vector<8xf32> to vector<8x1xf32>
    %60 = math.log %59 : vector<8x1xf32>
    %61 = vector.broadcast %60 : vector<8x1xf32> to vector<8x128xf32>
    %62 = arith.subf %56, %61 : vector<8x128xf32>
    %c0_29 = arith.constant 0 : index
    %c0_30 = arith.constant 0 : index
    %63 = vector.load %arg10[%c0_29, %c0_30] : memref<8x128xf32, #tpu.memory_space<vmem>>, vector<8x128xf32>
    tpu.vector_store %arg10[%c0_29, %c0_30], %62 {strides = array<i32>} : memref<8x128xf32, #tpu.memory_space<vmem>>, vector<8x128xf32>,
    return
  }
  func.func @transform_0(%arg0: i32) -> (i32, i32) {
    %c0_i32 = arith.constant 0 : i32
    %c0_i32_0 = arith.constant 0 : i32
    return %arg0, %c0_i32 : i32, i32
  }
  func.func @transform_1(%arg0: i32) -> (i32, i32) {
    %c0_i32 = arith.constant 0 : i32
    %c0_i32_0 = arith.constant 0 : i32
    %c0_i32_1 = arith.constant 0 : i32
    return %c0_i32, %c0_i32_0 : i32, i32
  }
  func.func @transform_2(%arg0: i32) -> (i32, i32) {
    %c0_i32 = arith.constant 0 : i32
    %c0_i32_0 = arith.constant 0 : i32
    %c0_i32_1 = arith.constant 0 : i32
    return %c0_i32, %c0_i32_0 : i32, i32
  }
  func.func @transform_3(%arg0: i32) -> (i32, i32) {
    %c0_i32 = arith.constant 0 : i32
    %c0_i32_0 = arith.constant 0 : i32
    %c0_i32_1 = arith.constant 0 : i32
    return %c0_i32, %c0_i32_0 : i32, i32
  }
  func.func @transform_4(%arg0: i32) -> (i32, i32) {
    %c0_i32 = arith.constant 0 : i32
    %c0_i32_0 = arith.constant 0 : i32
    %c0_i32_1 = arith.constant 0 : i32
    return %c0_i32, %c0_i32_0 : i32, i32
  }
  func.func @transform_5(%arg0: i32) -> (i32, i32) {
    %c0_i32 = arith.constant 0 : i32
    %c0_i32_0 = arith.constant 0 : i32
    %c0_i32_1 = arith.constant 0 : i32
    return %c0_i32, %c0_i32_0 : i32, i32
  }
  func.func @transform_6(%arg0: i32) -> (i32, i32) {
    %c0_i32 = arith.constant 0 : i32
    %c0_i32_0 = arith.constant 0 : i32
    %c0_i32_1 = arith.constant 0 : i32
    return %c0_i32, %c0_i32_0 : i32, i32
  }
  func.func @transform_7(%arg0: i32) -> (i32, i32) {
    %c0_i32 = arith.constant 0 : i32
    %c0_i32_0 = arith.constant 0 : i32
    %c0_i32_1 = arith.constant 0 : i32
    return %c0_i32, %c0_i32_0 : i32, i32
  }
  func.func @transform_8(%arg0: i32) -> (i32, i32) {
    %c0_i32 = arith.constant 0 : i32
    %c0_i32_0 = arith.constant 0 : i32
    %c0_i32_1 = arith.constant 0 : i32
    return %c0_i32, %c0_i32_0 : i32, i32
  }
  func.func @transform_9(%arg0: i32) -> (i32, i32) {
    %c0_i32 = arith.constant 0 : i32
    %c0_i32_0 = arith.constant 0 : i32
    return %arg0, %c0_i32 : i32, i32
  }
}

</mosaic_0001>

<bundles_post_ra>
// kernel: tpu_custom_call.1
= control target key start
LH: loop header
LB: loop body
LE: loop exit
PB: predicated region body
PF: predicated region fallthrough
CT: control target
= control target key end

     0   :  { %14 = vsyncpa [#allocation3], 0  ;;  %s1239_s0 = inlined_call_operand.hbm [shape: bf16[8,16], index: 0, kind: input, shape index: {}]   ;;  %s1240_s1 = inlined_call_operand.hbm [shape: bf16[16,256], index: 1, kind: input, shape index: {}]   ;;  %s1241_s2 = inlined_call_operand.vmem [shape: f32[1,256], index: 2, kind: input, shape index: {}]   ;;  %s1242_s3 = inlined_call_operand.hbm [shape: f32[8,128], index: 3, kind: input, shape index: {}]   ;;  %s1243_s4 = inlined_call_operand.hbm [shape: bf16[128,128], index: 4, kind: input, shape index: {}]   ;;  %s1244_s5 = inlined_call_operand.hbm [shape: bf16[128,128], index: 5, kind: input, shape index: {}]   ;;  %s1245_s6 = inlined_call_operand.hbm [shape: bf16[128,128], index: 6, kind: input, shape index: {}]   ;;  %s1246_s7 = inlined_call_operand.hbm [shape: bf16[128,128], index: 7, kind: input, shape index: {}]   ;;  %s1247_s8 = inlined_call_operand.vmem [shape: f32[1,128], index: 8, kind: input, shape index: {}]   ;;  %s1248_s9 = inlined_call_operand.hbm [shape: f32[8,128], index: 9, kind: output, shape index: {}]  }
   0x1   :  { %15 = vsyncpa [#allocation6], 0 }
   0x2   :  { %16 = vsyncpa [#allocation9], 0 }
   0x3   :  { %17 = vsyncpa [#allocation12], 0 }
   0x4   :  { %18 = vsyncpa [#allocation4], 0  ;;  %s1092_s30 = smov [#allocation5]  }
   0x5   :  { %s34_s10 = sshll.u32 %s1092_s30, 4  ;;  %s35_s10 = int_to_ptr.vmem [resolvable:$true] %s34_s10 }
   0x6   :  { %s930_s11 = scalar_lea.vmem %s35_s10, 256  ;;  %p935_p1 = scmp.lt.s32.totalorder %s35_s10, %s35_s10 }
   0x7   :  { %p931_p0 = scmp.ne.s32.totalorder %s35_s10, %s930_s11  ;;  %p936_p2 = scmp.lt.s32.totalorder %s930_s11, %s930_s11 }
   0x9   :  { %p937_p3 = por %p936_p2, %p935_p1 }
   0xb   :  { %p938_p4 = pnand %p937_p3, %p931_p0 }
   0xd   :  { %941 = shalt.err (!%p938_p4)
}
   0xe   :  { %s1093_s12 = smov 128   ;;  %s1094_s13 = smov 8  }
   0xf   :  { %40 = dma.hbm_to_vmem [thread:$0]  %s1240_s1, 256, %s35_s10, [#allocation6], %s1093_s12, %s1093_s12, %s1094_s13  }
  0x10   :  { %s1095_s16 = smov [#allocation8]  }
  0x11   :  { %s58_s17 = sshll.u32 %s1095_s16, 4  ;;  %s59_s17 = int_to_ptr.vmem [resolvable:$true] %s58_s17 }
  0x12   :  { %s950_s18 = scalar_lea.vmem %s59_s17, 1024  ;;  %p955_p6 = scmp.lt.s32.totalorder %s59_s17, %s59_s17 }
  0x13   :  { %p951_p5 = scmp.ne.s32.totalorder %s59_s17, %s950_s18  ;;  %p956_p7 = scmp.lt.s32.totalorder %s950_s18, %s950_s18 }
  0x15   :  { %p957_p8 = por %p956_p7, %p955_p6 }
  0x17   :  { %p958_p9 = pnand %p957_p8, %p951_p5 }
  0x19   :  { %961 = shalt.err (!%p958_p9)
}
  0x1a   :  { %s1096_s19 = smov 64   ;;  %s1097_s20 = smov 4  }
  0x1b   :  { %64 = dma.hbm_to_vmem [thread:$0]  %s1243_s4, 1024, %s59_s17, [#allocation9], %s1096_s19, %s1096_s19, %s1097_s20  }
  0x1c   :  { %s1098_s1 = smov [#allocation11]   ;;  %s1099_s24 = smov [#allocation2]  }
  0x1d   :  { %s82_s23 = sshll.u32 %s1098_s1, 4  ;;  %s25_s25 = sshll.u32 %s1099_s24, 4  ;;  %s83_s23 = int_to_ptr.vmem [resolvable:$true] %s82_s23  ;;  %s26_s25 = int_to_ptr.vmem [resolvable:$true] %s25_s25 }
  0x1e   :  { %s970_s26 = scalar_lea.vmem %s83_s23, 1024  ;;  %p975_p11 = scmp.lt.s32.totalorder %s83_s23, %s83_s23 }
  0x1f   :  { %p971_p10 = scmp.ne.s32.totalorder %s83_s23, %s970_s26  ;;  %p976_p12 = scmp.lt.s32.totalorder %s970_s26, %s970_s26 }
  0x21   :  { %p977_p13 = por %p976_p12, %p975_p11 }
  0x23   :  { %p978_p0 = pnand %p977_p13, %p971_p10 }
  0x25   :  { %981 = shalt.err (!%p978_p0)
}
  0x26   :  { %88 = dma.hbm_to_vmem [thread:$0]  %s1245_s6, 1024, %s83_s23, [#allocation12], %s1096_s19, %s1096_s19, %s1097_s20  }
  0x27   :  { %s990_s4 = scalar_lea.vmem %s26_s25, 64  ;;  %p995_p2 = scmp.lt.s32.totalorder %s26_s25, %s26_s25 }
  0x28   :  { %p991_p1 = scmp.ne.s32.totalorder %s26_s25, %s990_s4  ;;  %p996_p3 = scmp.lt.s32.totalorder %s990_s4, %s990_s4 }
  0x2a   :  { %p997_p4 = por %p996_p3, %p995_p2 }
  0x2c   :  { %p998_p5 = pnand %p997_p4, %p991_p1 }
  0x2e   :  { %1001 = shalt.err (!%p998_p5)
}
  0x2f   :  { %28 = dma.hbm_to_vmem [thread:$0]  %s1239_s0, 64, %s26_s25, [#allocation3]  }
  0x30   :  { %s1100_s10 = smov [#allocation7]   ;;  %s1101_s12 = smov [#allocation10]  }
  0x31   :  { %s49_s11 = sshll.u32 %s1100_s10, 4  ;;  %s70_s13 = sshll.u32 %s1101_s12, 4  ;;  %s50_s11 = int_to_ptr.vmem [resolvable:$true] %s49_s11  ;;  %s71_s13 = int_to_ptr.vmem [resolvable:$true] %s70_s13 }
  0x32   :  { %s1010_s14 = scalar_lea.vmem %s50_s11, 128  ;;  %p1015_p7 = scmp.lt.s32.totalorder %s50_s11, %s50_s11 }
  0x33   :  { %p1011_p6 = scmp.ne.s32.totalorder %s50_s11, %s1010_s14  ;;  %p1016_p8 = scmp.lt.s32.totalorder %s1010_s14, %s1010_s14 }
  0x35   :  { %p1017_p9 = por %p1016_p8, %p1015_p7 }
  0x37   :  { %p1018_p10 = pnand %p1017_p9, %p1011_p6 }
  0x39   :  { %1021 = shalt.err (!%p1018_p10)
}
  0x3a   :  { %52 = dma.hbm_to_vmem [thread:$0]  %s1242_s3, 128, %s50_s11, [#allocation6]  }
  0x3b   :  { %s1030_s16 = scalar_lea.vmem %s71_s13, 1024  ;;  %p1035_p12 = scmp.lt.s32.totalorder %s71_s13, %s71_s13 }
  0x3c   :  { %p1031_p11 = scmp.ne.s32.totalorder %s71_s13, %s1030_s16  ;;  %p1036_p13 = scmp.lt.s32.totalorder %s1030_s16, %s1030_s16 }
  0x3e   :  { %p1037_p0 = por %p1036_p13, %p1035_p12 }
  0x40   :  { %p1038_p1 = pnand %p1037_p0, %p1031_p11 }
  0x42   :  { %1041 = shalt.err (!%p1038_p1)
}
  0x43   :  { %76 = dma.hbm_to_vmem [thread:$0]  %s1244_s5, 1024, %s71_s13, [#allocation9], %s1096_s19, %s1096_s19, %s1097_s20  }
  0x44   :  { %s1102_s18 = smov [#allocation13]  }
  0x45   :  { %s94_s21 = sshll.u32 %s1102_s18, 4  ;;  %s95_s21 = int_to_ptr.vmem [resolvable:$true] %s94_s21 }
  0x46   :  { %s1050_s22 = scalar_lea.vmem %s95_s21, 1024  ;;  %p1055_p3 = scmp.lt.s32.totalorder %s95_s21, %s95_s21 }
  0x47   :  { %p1051_p2 = scmp.ne.s32.totalorder %s95_s21, %s1050_s22  ;;  %p1056_p4 = scmp.lt.s32.totalorder %s1050_s22, %s1050_s22 }
  0x49   :  { %p1057_p5 = por %p1056_p4, %p1055_p3 }
  0x4b   :  { %p1058_p6 = pnand %p1057_p5, %p1051_p2 }
  0x4d   :  { %1061 = shalt.err (!%p1058_p6)
}
  0x4e   :  { %100 = dma.hbm_to_vmem [thread:$0]  %s1246_s7, 1024, %s95_s21, [#allocation12], %s1096_s19, %s1096_s19, %s1097_s20  }
  0x4f   :  { %1082 = dma.done.wait [#allocation3], 64  }
  0x50   :  { %1083 = vsyncadd [#allocation3], 4294967232 }
  0x51   :  { %1084 = dma.done.wait [#allocation6], 384  }
  0x52   :  { %1085 = vsyncadd [#allocation6], 4294966912 }
  0x53   :  { %1086 = dma.done.wait [#allocation9], 2048  }
  0x54   :  { %1087 = vsyncadd [#allocation9], 4294965248 }
  0x55   :  { %1088 = dma.done.wait [#allocation12], 2048  }
  0x56   :  { %1089 = vsyncadd [#allocation12], 4294965248  ;;  %v1103_v0 = vmov 0   ;;  %v869_v1 = vld [vmem:[#allocation5 + $0x4] ss:$8 sps:$4 sm:$0xff]   ;;  %vm150_vm0 = vcmask 130048   ;;  %v130_v13 = vlaneseq }
  0x57   :  { %186 = vmatprep.mubr.bf16.mxu0 %v1103_v0  ;;  %v871_v2 = vld [vmem:[#allocation5] ss:$8 sps:$4 sm:$0xff]   ;;  %v125_v3 = vld [vmem:[#allocation2] sm:$0xf]  ;;  %168 = vmatprep.subr.bf16.mxu0 %v869_v1  ;;  %v872_v4 = vld [vmem:[#allocation8 + $0x38] sm:$0xff]   ;;  %v1104_v5 = vmov 0.0  }
  0x58   :  { %169 = vmatpush1.bf16.msra.mxu0 %v871_v2  ;;  %774 = vmatprep.subr.bf16.mxu1 %v1104_v5  ;;  %v873_v6 = vld [vmem:[#allocation8 + $0x30] sm:$0xff]   ;;  %v874_v7 = vld [vmem:[#allocation8 + $0x28] sm:$0xff]   ;;  %v875_v8 = vld [vmem:[#allocation8 + $0x20] sm:$0xff]   ;;  %vm1105_vm1 = vmmov 0   ;;  %v131_v14 = vshrl.u32 %v130_v13, 7  ;;  %s1106_s20 = smov [#allocation14]  }
  0x59   :  { %794 = vmatprep.subr.bf16.mxu0 %v1104_v5  ;;  %775 = vmatpush3.bf16.msra.mxu1 %v872_v4  ;;  %v876_v9 = vld [vmem:[#allocation8 + $0x18] sm:$0xff]   ;;  %v877_v10 = vld [vmem:[#allocation8 + $0x10] sm:$0xff]   ;;  %v878_v11 = vld [vmem:[#allocation8 + $0x8] sm:$0xff]   ;;  %s683_s23 = sshll.u32 %s1106_s20, 4  ;;  %s684_s23 = int_to_ptr.vmem [resolvable:$true] %s683_s23 }
  0x5a   :  { %776 = vmatprep.subr.bf16.mxu1 %v1104_v5  ;;  %790 = vmatprep.mubr.msk.bf16.mxu1 %vm1105_vm1, %v1104_v5  ;;  %v879_v12 = vld [vmem:[#allocation8] sm:$0xff]   ;;  %v136_v15 = vsub.s32 1, %v131_v14  ;;  %v132_v26 = vsub.s32 0, %v131_v14  ;;  %v699_v29 = vld [vmem:[#allocation7] ss:$0 sm:$0xff]  ;;  %v881_v34 = vld [vmem:[#allocation10 + $0x30] sm:$0xff]   ;;  %p1067_p8 = scmp.lt.s32.totalorder %s684_s23, %s684_s23 }
  0x5b   :  { %697 = vmatmul.mubr.msk.bf16.vlgmr.msra.gmra.mxu0 %vm150_vm0, %v125_v3  ;;  %v128_v16 = vld [vmem:[%s1241_s2] sm:$0x3]  ;;  %v880_v31 = vld [vmem:[#allocation10 + $0x38] sm:$0xff]   ;;  %v882_v37 = vld [vmem:[#allocation10 + $0x28] sm:$0xff]  }
  0x5c   :  { %810 = vmatprep.mubr.msk.bf16.mxu0 %vm1105_vm1, %v1104_v5  ;;  %v137_v17 = vrot.slane %v128_v16, %v136_v15  ;;  %v133_v27 = vrot.slane %v128_v16, %v132_v26  ;;  %v700_v36 = vld [vmem:[#allocation7 + $0x1] ss:$0 sm:$0xff]  ;;  %v883_v39 = vld [vmem:[#allocation10 + $0x20] sm:$0xff]   ;;  %v885_v42 = vld [vmem:[#allocation10 + $0x10] sm:$0xff]  }
  0x5d   :  { %777 = vmatpush3.bf16.msra.mxu1 %v873_v6  ;;  %v884_v41 = vld [vmem:[#allocation10 + $0x18] sm:$0xff]   ;;  %v886_v43 = vld [vmem:[#allocation10 + $0x8] sm:$0xff]   ;;  %v887_v44 = vld [vmem:[#allocation10] sm:$0xff]  }
  0x5e   :  { %778 = vmatprep.subr.bf16.mxu1 %v1104_v5  ;;  %v888_v47 = vld [vmem:[#allocation11 + $0x38] sm:$0xff]   ;;  %v889_v48 = vld [vmem:[#allocation11 + $0x30] sm:$0xff]   ;;  %v890_v49 = vld [vmem:[#allocation11 + $0x28] sm:$0xff]  }
  0x5f   :  { %795 = vmatpush3.bf16.msra.mxu0 %v888_v47  ;;  %v891_v50 = vld [vmem:[#allocation11 + $0x20] sm:$0xff]   ;;  %v892_v51 = vld [vmem:[#allocation11 + $0x18] sm:$0xff]   ;;  %v893_v52 = vld [vmem:[#allocation11 + $0x10] sm:$0xff]  }
  0x60   :  { %796 = vmatprep.subr.bf16.mxu0 %v1104_v5  ;;  %v894_v53 = vld [vmem:[#allocation11 + $0x8] sm:$0xff]   ;;  %v895_v54 = vld [vmem:[#allocation11] sm:$0xff]   ;;  %v701_v55 = vld [vmem:[#allocation7 + $0x2] ss:$0 sm:$0xff] }
  0x61   :  { %779 = vmatpush3.bf16.msra.mxu1 %v874_v7  ;;  %v896_v7 = vld [vmem:[#allocation13 + $0x38] sm:$0xff]   ;;  %v902_v13 = vld [vmem:[#allocation13 + $0x8] sm:$0xff]   ;;  %v903_v14 = vld [vmem:[#allocation13] sm:$0xff]  }
  0x62   :  { %780 = vmatprep.subr.bf16.mxu1 %v1104_v5  ;;  %v727_v15 = vld [vmem:[#allocation7 + $0x3] ss:$0 sm:$0xff] }
  0x63   :  { %797 = vmatpush3.bf16.msra.mxu0 %v889_v48 }
  0x64   :  { %798 = vmatprep.subr.bf16.mxu0 %v1104_v5 }
  0x65   :  { %781 = vmatpush3.bf16.msra.mxu1 %v875_v8  ;;  %v897_v8 = vld [vmem:[#allocation13 + $0x30] sm:$0xff]  }
  0x66   :  { %782 = vmatprep.subr.bf16.mxu1 %v1104_v5 }
  0x67   :  { %799 = vmatpush3.bf16.msra.mxu0 %v890_v49 }
  0x68   :  { %800 = vmatprep.subr.bf16.mxu0 %v1104_v5 }
  0x69   :  { %783 = vmatpush3.bf16.msra.mxu1 %v876_v9  ;;  %v898_v9 = vld [vmem:[#allocation13 + $0x28] sm:$0xff]  }
  0x6a   :  { %784 = vmatprep.subr.bf16.mxu1 %v1104_v5 }
  0x6b   :  { %801 = vmatpush3.bf16.msra.mxu0 %v891_v50 }
  0x6c   :  { %802 = vmatprep.subr.bf16.mxu0 %v1104_v5 }
  0x6d   :  { %785 = vmatpush3.bf16.msra.mxu1 %v877_v10  ;;  %v899_v10 = vld [vmem:[#allocation13 + $0x20] sm:$0xff]  }
  0x6e   :  { %786 = vmatprep.subr.bf16.mxu1 %v1104_v5 }
  0x6f   :  { %803 = vmatpush3.bf16.msra.mxu0 %v892_v51 }
  0x70   :  { %804 = vmatprep.subr.bf16.mxu0 %v1104_v5 }
  0x71   :  { %787 = vmatpush3.bf16.msra.mxu1 %v878_v11  ;;  %v900_v11 = vld [vmem:[#allocation13 + $0x18] sm:$0xff]  }
  0x72   :  { %788 = vmatprep.subr.bf16.mxu1 %v1104_v5 }
  0x73   :  { %805 = vmatpush3.bf16.msra.mxu0 %v893_v52 }
  0x74   :  { %806 = vmatprep.subr.bf16.mxu0 %v1104_v5 }
  0x75   :  { %789 = vmatpush3.bf16.msra.mxu1 %v879_v12  ;;  %v901_v12 = vld [vmem:[#allocation13 + $0x10] sm:$0xff]  }
  0x76   :  { %814 = vmatprep.subr.bf16.mxu1 %v1104_v5 }
  0x77   :  { %807 = vmatpush3.bf16.msra.mxu0 %v894_v53 }
  0x78   :  { %808 = vmatprep.subr.bf16.mxu0 %v1104_v5 }
  0x7b   :  { %809 = vmatpush3.bf16.msra.mxu0 %v895_v54 }
  0x7c   :  { %834 = vmatprep.subr.bf16.mxu0 %v1104_v5 }
 0x11b   :  { %v188_v18 = vpop.f32.mrf.mxu0 }
 0x11c   :  { %v189_v28 = vadd.f32 %v188_v18, %v133_v27 }
 0x11d   :  { %v190_v19 = vpop.f32.mrf.mxu0 }
 0x11e   :  { %v191_v20 = vadd.f32 %v190_v19, %v137_v17  ;;  %v209_v32 = vsub.f32 %v189_v28, %v699_v29 }
 0x11f   :  { %v192_v21 = vpop.f32.mrf.mxu0 }
 0x120   :  { %v698_v22 = vmul.f32 -1.442695, %v191_v20  ;;  %v210_v35 = vmul.f32 %v209_v32, %v209_v32 }
 0x121   :  { %v193_v23 = vpop.f32.mrf.mxu0 }
 0x122   :  { %904 = vpow2.f32 %v698_v22  ;;  %v215_v38 = vmul.f32 %v700_v36, %v210_v35 }
 0x124   :  { %v216_v40 = vmul.f32 1.442695, %v215_v38 }
 0x12f   :  { %v905_v24 = vpop.eup %904 }
 0x130   :  { %v198_v25 = vadd.f32 1.0, %v905_v24 }
 0x132   :  { %906 = vrcp.f32 %v198_v25 }
 0x133   :  { %908 = vpow2.f32 %v216_v40 }
 0x13f   :  { %v907_v30 = vpop.eup %906 }
 0x140   :  { %v218_v33 = vpack.c.bf16 %v907_v30, %v907_v30  ;;  %v909_v45 = vpop.eup %908 }
 0x141   :  { %v333_v46 = vpack.c.bf16 %v909_v45, %v909_v45 }
 0x142   :  { %791 = vmatmul.mubr.bf16.vlgmr.msra.gmra.mxu1 %v218_v33 }
 0x143   :  { %815 = vmatpush3.bf16.msra.mxu1 %v880_v31  ;;  %830 = vmatprep.mubr.msk.bf16.mxu1 %vm1105_vm1, %v1104_v5 }
 0x144   :  { %816 = vmatprep.subr.bf16.mxu1 %v1104_v5 }
 0x147   :  { %817 = vmatpush3.bf16.msra.mxu1 %v881_v34 }
 0x148   :  { %818 = vmatprep.subr.bf16.mxu1 %v1104_v5 }
 0x14b   :  { %819 = vmatpush3.bf16.msra.mxu1 %v882_v37 }
 0x14c   :  { %820 = vmatprep.subr.bf16.mxu1 %v1104_v5 }
 0x14f   :  { %821 = vmatpush3.bf16.msra.mxu1 %v883_v39 }
 0x150   :  { %822 = vmatprep.subr.bf16.mxu1 %v1104_v5 }
 0x153   :  { %823 = vmatpush3.bf16.msra.mxu1 %v884_v41 }
 0x154   :  { %824 = vmatprep.subr.bf16.mxu1 %v1104_v5 }
 0x157   :  { %825 = vmatpush3.bf16.msra.mxu1 %v885_v42 }
 0x158   :  { %826 = vmatprep.subr.bf16.mxu1 %v1104_v5 }
 0x15b   :  { %827 = vmatpush3.bf16.msra.mxu1 %v886_v43 }
 0x15c   :  { %828 = vmatprep.subr.bf16.mxu1 %v1104_v5 }
 0x15f   :  { %829 = vmatpush3.bf16.msra.mxu1 %v887_v44 }
 0x162   :  { %831 = vmatmul.mubr.bf16.vlgmr.msra.gmra.mxu1 %v333_v46 }
 0x202   :  { %v321_v56 = vpop.f32.mrf.mxu1 }
 0x203   :  { %v322_v57 = vadd.f32 %v701_v55, %v321_v56 }
 0x204   :  { %v792_v58 = vpop.f32.mrf.mxu1 }
 0x205   :  { %v710_v59 = vmul.f32 -1.442695, %v322_v57 }
 0x206   :  { %v324_v60 = vpop.f32.mrf.mxu1 }
 0x207   :  { %910 = vpow2.f32 %v710_v59 }
 0x208   :  { %v793_v61 = vpop.f32.mrf.mxu1 }
 0x214   :  { %v911_v62 = vpop.eup %910 }
 0x215   :  { %v330_v63 = vadd.f32 1.0, %v911_v62 }
 0x217   :  { %912 = vrcp.f32 %v330_v63 }
 0x222   :  { %v537_v0 = vpop.f32.mrf.mxu1 }
 0x224   :  { %v913_v1 = vpop.eup %912  ;;  %v832_v2 = vpop.f32.mrf.mxu1 }
 0x225   :  { %v350_v3 = vpack.c.bf16 %v913_v1, %v913_v1 }
 0x226   :  { %v540_v4 = vpop.f32.mrf.mxu1 }
 0x227   :  { %811 = vmatmul.mubr.bf16.vlgmr.msra.gmra.mxu0 %v350_v3 }
 0x228   :  { %v833_v6 = vpop.f32.mrf.mxu1  ;;  %850 = vmatprep.mubr.msk.bf16.mxu0 %vm1105_vm1, %v1104_v5  ;;  %835 = vmatpush3.bf16.msra.mxu0 %v896_v7 }
 0x229   :  { %836 = vmatprep.subr.bf16.mxu0 %v1104_v5 }
 0x22c   :  { %837 = vmatpush3.bf16.msra.mxu0 %v897_v8 }
 0x22d   :  { %838 = vmatprep.subr.bf16.mxu0 %v1104_v5 }
 0x230   :  { %839 = vmatpush3.bf16.msra.mxu0 %v898_v9 }
 0x231   :  { %840 = vmatprep.subr.bf16.mxu0 %v1104_v5 }
 0x234   :  { %841 = vmatpush3.bf16.msra.mxu0 %v899_v10 }
 0x235   :  { %842 = vmatprep.subr.bf16.mxu0 %v1104_v5 }
 0x238   :  { %843 = vmatpush3.bf16.msra.mxu0 %v900_v11 }
 0x239   :  { %844 = vmatprep.subr.bf16.mxu0 %v1104_v5 }
 0x23c   :  { %845 = vmatpush3.bf16.msra.mxu0 %v901_v12 }
 0x23d   :  { %846 = vmatprep.subr.bf16.mxu0 %v1104_v5 }
 0x240   :  { %847 = vmatpush3.bf16.msra.mxu0 %v902_v13 }
 0x241   :  { %848 = vmatprep.subr.bf16.mxu0 %v1104_v5  ;;  %v729_v5 = vld [vmem:[%s1247_s8] ss:$0 sm:$0xff]  ;;  %s1062_s8 = scalar_lea.vmem %s684_s23, 128 }
 0x242   :  { %p1063_p7 = scmp.ne.s32.totalorder %s684_s23, %s1062_s8  ;;  %p1068_p9 = scmp.lt.s32.totalorder %s1062_s8, %s1062_s8 }
 0x244   :  { %849 = vmatpush3.bf16.msra.mxu0 %v903_v14  ;;  %p1069_p10 = por %p1068_p9, %p1067_p8 }
 0x246   :  { %p1070_p11 = pnand %p1069_p10, %p1063_p7 }
 0x2e7   :  { %v449_v16 = vpop.f32.mrf.mxu0 }
 0x2e8   :  { %v538_v17 = vadd.f32 %v537_v0, %v449_v16 }
 0x2e9   :  { %v812_v18 = vpop.f32.mrf.mxu0 }
 0x2ea   :  { %v547_v19 = vadd.f32 %v727_v15, %v538_v17 }
 0x2eb   :  { %v452_v20 = vpop.f32.mrf.mxu0 }
 0x2ec   :  { %v728_v21 = vmul.f32 -1.442695, %v547_v19 }
 0x2ed   :  { %v813_v22 = vpop.f32.mrf.mxu0 }
 0x2ee   :  { %914 = vpow2.f32 %v728_v21 }
 0x2fb   :  { %v915_v23 = vpop.eup %914 }
 0x2fc   :  { %v551_v24 = vadd.f32 1.0, %v915_v23 }
 0x2fe   :  { %916 = vrcp.f32 %v551_v24 }
 0x30b   :  { %v917_v25 = vpop.eup %916 }
 0x30c   :  { %v554_v26 = vpack.c.bf16 %v917_v25, %v917_v25 }
 0x30e   :  { %851 = vmatmul.mubr.bf16.vlgmr.msra.gmra.mxu0 %v554_v26 }
 0x3ce   :  { %v660_v27 = vpop.f32.mrf.mxu0 }
 0x3cf   :  { %v661_v28 = vadd.f32 %v729_v5, %v660_v27 }
 0x3d0   :  { %v852_v29 = vpop.f32.mrf.mxu0 }
 0x3d1   :  { %666 = vmax.xlane.f32.xlu0 %v661_v28 }
 0x3d2   :  { %v663_v30 = vpop.f32.mrf.mxu0 }
 0x3d4   :  { %v853_v31 = vpop.f32.mrf.mxu0 }
 0x45a   :  { %v667_v32 = vpop.xlane.xlu0 %666 }
 0x45b   :  { %v668_v33 = vsub.f32 %v661_v28, %v667_v32 }
 0x45d   :  { %v669_v34 = vmul.f32 1.442695, %v668_v33 }
 0x45f   :  { %918 = vpow2.f32 %v669_v34 }
 0x46c   :  { %v919_v35 = vpop.eup %918 }
 0x46d   :  { %671 = vadd.xlane.f32.xlu0 %v919_v35 }
 0x4f6   :  { %v672_v36 = vpop.xlane.xlu0 %671 }
 0x4f7   :  { %920 = vlog2.f32 %v672_v36 }
 0x504   :  { %v921_v37 = vpop.eup %920 }
 0x505   :  { %v674_v38 = vmul.f32 0.6931472, %v921_v37 }
 0x507   :  { %v675_v39 = vsub.f32 %v668_v33, %v674_v38 }
 0x509   :  { %676 = vst [vmem:[#allocation14] sm:$0xff] %v675_v39 }
 0x50a   :  { %1073 = shalt.err (!%p1070_p11)
}
 0x50b   :  { %686 = dma.vmem_to_hbm [thread:$0]  %s684_s23, 128, %s1248_s9, [#allocation4]  }
 0x50c   :  { %1090 = dma.done.wait [#allocation4], 128  }
 0x50d   :  { %1091 = vsyncadd [#allocation4], 4294967168 }
 0x50e   :  { %690 = vsyncpa [#allocation3], 1 }
 0x50f   :  { %691 = vsyncpa [#allocation6], 1 }
 0x510   :  { %692 = vsyncpa [#allocation9], 1 }
 0x511   :  { %693 = vsyncpa [#allocation12], 1 }
 0x512   :  { %694 = vsyncpa [#allocation4], 1 }

// kernel: tpu_custom_call.1
= control target key start
LH: loop header
LB: loop body
LE: loop exit
PB: predicated region body
PF: predicated region fallthrough
CT: control target
= control target key end

     0   :  { %14 = vsyncpa [#allocation3], 0  ;;  %s1239_s0 = inlined_call_operand.hbm [shape: bf16[8,16], index: 0, kind: input, shape index: {}]   ;;  %s1240_s1 = inlined_call_operand.hbm [shape: bf16[16,256], index: 1, kind: input, shape index: {}]   ;;  %s1241_s2 = inlined_call_operand.vmem [shape: f32[1,256], index: 2, kind: input, shape index: {}]   ;;  %s1242_s3 = inlined_call_operand.hbm [shape: f32[8,128], index: 3, kind: input, shape index: {}]   ;;  %s1243_s4 = inlined_call_operand.hbm [shape: bf16[128,128], index: 4, kind: input, shape index: {}]   ;;  %s1244_s5 = inlined_call_operand.hbm [shape: bf16[128,128], index: 5, kind: input, shape index: {}]   ;;  %s1245_s6 = inlined_call_operand.hbm [shape: bf16[128,128], index: 6, kind: input, shape index: {}]   ;;  %s1246_s7 = inlined_call_operand.hbm [shape: bf16[128,128], index: 7, kind: input, shape index: {}]   ;;  %s1247_s8 = inlined_call_operand.vmem [shape: f32[1,128], index: 8, kind: input, shape index: {}]   ;;  %s1248_s9 = inlined_call_operand.hbm [shape: f32[8,128], index: 9, kind: output, shape index: {}]  }
   0x1   :  { %15 = vsyncpa [#allocation6], 0 }
   0x2   :  { %16 = vsyncpa [#allocation9], 0 }
   0x3   :  { %17 = vsyncpa [#allocation12], 0 }
   0x4   :  { %18 = vsyncpa [#allocation4], 0  ;;  %s1092_s30 = smov [#allocation5]  }
   0x5   :  { %s34_s10 = sshll.u32 %s1092_s30, 4  ;;  %s35_s10 = int_to_ptr.vmem [resolvable:$true] %s34_s10 }
   0x6   :  { %s930_s11 = scalar_lea.vmem %s35_s10, 256  ;;  %p935_p1 = scmp.lt.s32.totalorder %s35_s10, %s35_s10 }
   0x7   :  { %p931_p0 = scmp.ne.s32.totalorder %s35_s10, %s930_s11  ;;  %p936_p2 = scmp.lt.s32.totalorder %s930_s11, %s930_s11 }
   0x9   :  { %p937_p3 = por %p936_p2, %p935_p1 }
   0xb   :  { %p938_p4 = pnand %p937_p3, %p931_p0 }
   0xd   :  { %941 = shalt.err (!%p938_p4)
}
   0xe   :  { %s1093_s12 = smov 128   ;;  %s1094_s13 = smov 8  }
   0xf   :  { %40 = dma.hbm_to_vmem [thread:$0]  %s1240_s1, 256, %s35_s10, [#allocation6], %s1093_s12, %s1093_s12, %s1094_s13  }
  0x10   :  { %s1095_s16 = smov [#allocation8]  }
  0x11   :  { %s58_s17 = sshll.u32 %s1095_s16, 4  ;;  %s59_s17 = int_to_ptr.vmem [resolvable:$true] %s58_s17 }
  0x12   :  { %s950_s18 = scalar_lea.vmem %s59_s17, 1024  ;;  %p955_p6 = scmp.lt.s32.totalorder %s59_s17, %s59_s17 }
  0x13   :  { %p951_p5 = scmp.ne.s32.totalorder %s59_s17, %s950_s18  ;;  %p956_p7 = scmp.lt.s32.totalorder %s950_s18, %s950_s18 }
  0x15   :  { %p957_p8 = por %p956_p7, %p955_p6 }
  0x17   :  { %p958_p9 = pnand %p957_p8, %p951_p5 }
  0x19   :  { %961 = shalt.err (!%p958_p9)
}
  0x1a   :  { %s1096_s19 = smov 64   ;;  %s1097_s20 = smov 4  }
  0x1b   :  { %64 = dma.hbm_to_vmem [thread:$0]  %s1243_s4, 1024, %s59_s17, [#allocation9], %s1096_s19, %s1096_s19, %s1097_s20  }
  0x1c   :  { %s1098_s1 = smov [#allocation11]   ;;  %s1099_s24 = smov [#allocation2]  }
  0x1d   :  { %s82_s23 = sshll.u32 %s1098_s1, 4  ;;  %s25_s25 = sshll.u32 %s1099_s24, 4  ;;  %s83_s23 = int_to_ptr.vmem [resolvable:$true] %s82_s23  ;;  %s26_s25 = int_to_ptr.vmem [resolvable:$true] %s25_s25 }
  0x1e   :  { %s970_s26 = scalar_lea.vmem %s83_s23, 1024  ;;  %p975_p11 = scmp.lt.s32.totalorder %s83_s23, %s83_s23 }
  0x1f   :  { %p971_p10 = scmp.ne.s32.totalorder %s83_s23, %s970_s26  ;;  %p976_p12 = scmp.lt.s32.totalorder %s970_s26, %s970_s26 }
  0x21   :  { %p977_p13 = por %p976_p12, %p975_p11 }
  0x23   :  { %p978_p0 = pnand %p977_p13, %p971_p10 }
  0x25   :  { %981 = shalt.err (!%p978_p0)
}
  0x26   :  { %88 = dma.hbm_to_vmem [thread:$0]  %s1245_s6, 1024, %s83_s23, [#allocation12], %s1096_s19, %s1096_s19, %s1097_s20  }
  0x27   :  { %s990_s4 = scalar_lea.vmem %s26_s25, 64  ;;  %p995_p2 = scmp.lt.s32.totalorder %s26_s25, %s26_s25 }
  0x28   :  { %p991_p1 = scmp.ne.s32.totalorder %s26_s25, %s990_s4  ;;  %p996_p3 = scmp.lt.s32.totalorder %s990_s4, %s990_s4 }
  0x2a   :  { %p997_p4 = por %p996_p3, %p995_p2 }
  0x2c   :  { %p998_p5 = pnand %p997_p4, %p991_p1 }
  0x2e   :  { %1001 = shalt.err (!%p998_p5)
}
  0x2f   :  { %28 = dma.hbm_to_vmem [thread:$0]  %s1239_s0, 64, %s26_s25, [#allocation3]  }
  0x30   :  { %s1100_s10 = smov [#allocation7]   ;;  %s1101_s12 = smov [#allocation10]  }
  0x31   :  { %s49_s11 = sshll.u32 %s1100_s10, 4  ;;  %s70_s13 = sshll.u32 %s1101_s12, 4  ;;  %s50_s11 = int_to_ptr.vmem [resolvable:$true] %s49_s11  ;;  %s71_s13 = int_to_ptr.vmem [resolvable:$true] %s70_s13 }
  0x32   :  { %s1010_s14 = scalar_lea.vmem %s50_s11, 128  ;;  %p1015_p7 = scmp.lt.s32.totalorder %s50_s11, %s50_s11 }
  0x33   :  { %p1011_p6 = scmp.ne.s32.totalorder %s50_s11, %s1010_s14  ;;  %p1016_p8 = scmp.lt.s32.totalorder %s1010_s14, %s1010_s14 }
  0x35   :  { %p1017_p9 = por %p1016_p8, %p1015_p7 }
  0x37   :  { %p1018_p10 = pnand %p1017_p9, %p1011_p6 }
  0x39   :  { %1021 = shalt.err (!%p1018_p10)
}
  0x3a   :  { %52 = dma.hbm_to_vmem [thread:$0]  %s1242_s3, 128, %s50_s11, [#allocation6]  }
  0x3b   :  { %s1030_s16 = scalar_lea.vmem %s71_s13, 1024  ;;  %p1035_p12 = scmp.lt.s32.totalorder %s71_s13, %s71_s13 }
  0x3c   :  { %p1031_p11 = scmp.ne.s32.totalorder %s71_s13, %s1030_s16  ;;  %p1036_p13 = scmp.lt.s32.totalorder %s1030_s16, %s1030_s16 }
  0x3e   :  { %p1037_p0 = por %p1036_p13, %p1035_p12 }
  0x40   :  { %p1038_p1 = pnand %p1037_p0, %p1031_p11 }
  0x42   :  { %1041 = shalt.err (!%p1038_p1)
}
  0x43   :  { %76 = dma.hbm_to_vmem [thread:$0]  %s1244_s5, 1024, %s71_s13, [#allocation9], %s1096_s19, %s1096_s19, %s1097_s20  }
  0x44   :  { %s1102_s18 = smov [#allocation13]  }
  0x45   :  { %s94_s21 = sshll.u32 %s1102_s18, 4  ;;  %s95_s21 = int_to_ptr.vmem [resolvable:$true] %s94_s21 }
  0x46   :  { %s1050_s22 = scalar_lea.vmem %s95_s21, 1024  ;;  %p1055_p3 = scmp.lt.s32.totalorder %s95_s21, %s95_s21 }
  0x47   :  { %p1051_p2 = scmp.ne.s32.totalorder %s95_s21, %s1050_s22  ;;  %p1056_p4 = scmp.lt.s32.totalorder %s1050_s22, %s1050_s22 }
  0x49   :  { %p1057_p5 = por %p1056_p4, %p1055_p3 }
  0x4b   :  { %p1058_p6 = pnand %p1057_p5, %p1051_p2 }
  0x4d   :  { %1061 = shalt.err (!%p1058_p6)
}
  0x4e   :  { %100 = dma.hbm_to_vmem [thread:$0]  %s1246_s7, 1024, %s95_s21, [#allocation12], %s1096_s19, %s1096_s19, %s1097_s20  }
  0x4f   :  { %1082 = dma.done.wait [#allocation3], 64  }
  0x50   :  { %1083 = vsyncadd [#allocation3], 4294967232 }
  0x51   :  { %1084 = dma.done.wait [#allocation6], 384  }
  0x52   :  { %1085 = vsyncadd [#allocation6], 4294966912 }
  0x53   :  { %1086 = dma.done.wait [#allocation9], 2048  }
  0x54   :  { %1087 = vsyncadd [#allocation9], 4294965248 }
  0x55   :  { %1088 = dma.done.wait [#allocation12], 2048  }
  0x56   :  { %1089 = vsyncadd [#allocation12], 4294965248  ;;  %v1103_v0 = vmov 0   ;;  %v869_v1 = vld [vmem:[#allocation5 + $0x4] ss:$8 sps:$4 sm:$0xff]   ;;  %vm150_vm0 = vcmask 130048   ;;  %v130_v13 = vlaneseq }
  0x57   :  { %186 = vmatprep.mubr.bf16.mxu0 %v1103_v0  ;;  %v871_v2 = vld [vmem:[#allocation5] ss:$8 sps:$4 sm:$0xff]   ;;  %v125_v3 = vld [vmem:[#allocation2] sm:$0xf]  ;;  %168 = vmatprep.subr.bf16.mxu0 %v869_v1  ;;  %v872_v4 = vld [vmem:[#allocation8 + $0x38] sm:$0xff]   ;;  %v1104_v5 = vmov 0.0  }
  0x58   :  { %169 = vmatpush1.bf16.msra.mxu0 %v871_v2  ;;  %774 = vmatprep.subr.bf16.mxu1 %v1104_v5  ;;  %v873_v6 = vld [vmem:[#allocation8 + $0x30] sm:$0xff]   ;;  %v874_v7 = vld [vmem:[#allocation8 + $0x28] sm:$0xff]   ;;  %v875_v8 = vld [vmem:[#allocation8 + $0x20] sm:$0xff]   ;;  %vm1105_vm1 = vmmov 0   ;;  %v131_v14 = vshrl.u32 %v130_v13, 7  ;;  %s1106_s20 = smov [#allocation14]  }
  0x59   :  { %794 = vmatprep.subr.bf16.mxu0 %v1104_v5  ;;  %775 = vmatpush3.bf16.msra.mxu1 %v872_v4  ;;  %v876_v9 = vld [vmem:[#allocation8 + $0x18] sm:$0xff]   ;;  %v877_v10 = vld [vmem:[#allocation8 + $0x10] sm:$0xff]   ;;  %v878_v11 = vld [vmem:[#allocation8 + $0x8] sm:$0xff]   ;;  %s683_s23 = sshll.u32 %s1106_s20, 4  ;;  %s684_s23 = int_to_ptr.vmem [resolvable:$true] %s683_s23 }
  0x5a   :  { %776 = vmatprep.subr.bf16.mxu1 %v1104_v5  ;;  %790 = vmatprep.mubr.msk.bf16.mxu1 %vm1105_vm1, %v1104_v5  ;;  %v879_v12 = vld [vmem:[#allocation8] sm:$0xff]   ;;  %v136_v15 = vsub.s32 1, %v131_v14  ;;  %v132_v26 = vsub.s32 0, %v131_v14  ;;  %v699_v29 = vld [vmem:[#allocation7] ss:$0 sm:$0xff]  ;;  %v881_v34 = vld [vmem:[#allocation10 + $0x30] sm:$0xff]   ;;  %p1067_p8 = scmp.lt.s32.totalorder %s684_s23, %s684_s23 }
  0x5b   :  { %697 = vmatmul.mubr.msk.bf16.vlgmr.msra.gmra.mxu0 %vm150_vm0, %v125_v3  ;;  %v128_v16 = vld [vmem:[%s1241_s2] sm:$0x3]  ;;  %v880_v31 = vld [vmem:[#allocation10 + $0x38] sm:$0xff]   ;;  %v882_v37 = vld [vmem:[#allocation10 + $0x28] sm:$0xff]  }
  0x5c   :  { %810 = vmatprep.mubr.msk.bf16.mxu0 %vm1105_vm1, %v1104_v5  ;;  %v137_v17 = vrot.slane %v128_v16, %v136_v15  ;;  %v133_v27 = vrot.slane %v128_v16, %v132_v26  ;;  %v700_v36 = vld [vmem:[#allocation7 + $0x1] ss:$0 sm:$0xff]  ;;  %v883_v39 = vld [vmem:[#allocation10 + $0x20] sm:$0xff]   ;;  %v885_v42 = vld [vmem:[#allocation10 + $0x10] sm:$0xff]  }
  0x5d   :  { %777 = vmatpush3.bf16.msra.mxu1 %v873_v6  ;;  %v884_v41 = vld [vmem:[#allocation10 + $0x18] sm:$0xff]   ;;  %v886_v43 = vld [vmem:[#allocation10 + $0x8] sm:$0xff]   ;;  %v887_v44 = vld [vmem:[#allocation10] sm:$0xff]  }
  0x5e   :  { %778 = vmatprep.subr.bf16.mxu1 %v1104_v5  ;;  %v888_v47 = vld [vmem:[#allocation11 + $0x38] sm:$0xff]   ;;  %v889_v48 = vld [vmem:[#allocation11 + $0x30] sm:$0xff]   ;;  %v890_v49 = vld [vmem:[#allocation11 + $0x28] sm:$0xff]  }
  0x5f   :  { %795 = vmatpush3.bf16.msra.mxu0 %v888_v47  ;;  %v891_v50 = vld [vmem:[#allocation11 + $0x20] sm:$0xff]   ;;  %v892_v51 = vld [vmem:[#allocation11 + $0x18] sm:$0xff]   ;;  %v893_v52 = vld [vmem:[#allocation11 + $0x10] sm:$0xff]  }
  0x60   :  { %796 = vmatprep.subr.bf16.mxu0 %v1104_v5  ;;  %v894_v53 = vld [vmem:[#allocation11 + $0x8] sm:$0xff]   ;;  %v895_v54 = vld [vmem:[#allocation11] sm:$0xff]   ;;  %v701_v55 = vld [vmem:[#allocation7 + $0x2] ss:$0 sm:$0xff] }
  0x61   :  { %779 = vmatpush3.bf16.msra.mxu1 %v874_v7  ;;  %v896_v7 = vld [vmem:[#allocation13 + $0x38] sm:$0xff]   ;;  %v902_v13 = vld [vmem:[#allocation13 + $0x8] sm:$0xff]   ;;  %v903_v14 = vld [vmem:[#allocation13] sm:$0xff]  }
  0x62   :  { %780 = vmatprep.subr.bf16.mxu1 %v1104_v5  ;;  %v727_v15 = vld [vmem:[#allocation7 + $0x3] ss:$0 sm:$0xff] }
  0x63   :  { %797 = vmatpush3.bf16.msra.mxu0 %v889_v48 }
  0x64   :  { %798 = vmatprep.subr.bf16.mxu0 %v1104_v5 }
  0x65   :  { %781 = vmatpush3.bf16.msra.mxu1 %v875_v8  ;;  %v897_v8 = vld [vmem:[#allocation13 + $0x30] sm:$0xff]  }
  0x66   :  { %782 = vmatprep.subr.bf16.mxu1 %v1104_v5 }
  0x67   :  { %799 = vmatpush3.bf16.msra.mxu0 %v890_v49 }
  0x68   :  { %800 = vmatprep.subr.bf16.mxu0 %v1104_v5 }
  0x69   :  { %783 = vmatpush3.bf16.msra.mxu1 %v876_v9  ;;  %v898_v9 = vld [vmem:[#allocation13 + $0x28] sm:$0xff]  }
  0x6a   :  { %784 = vmatprep.subr.bf16.mxu1 %v1104_v5 }
  0x6b   :  { %801 = vmatpush3.bf16.msra.mxu0 %v891_v50 }
  0x6c   :  { %802 = vmatprep.subr.bf16.mxu0 %v1104_v5 }
  0x6d   :  { %785 = vmatpush3.bf16.msra.mxu1 %v877_v10  ;;  %v899_v10 = vld [vmem:[#allocation13 + $0x20] sm:$0xff]  }
  0x6e   :  { %786 = vmatprep.subr.bf16.mxu1 %v1104_v5 }
  0x6f   :  { %803 = vmatpush3.bf16.msra.mxu0 %v892_v51 }
  0x70   :  { %804 = vmatprep.subr.bf16.mxu0 %v1104_v5 }
  0x71   :  { %787 = vmatpush3.bf16.msra.mxu1 %v878_v11  ;;  %v900_v11 = vld [vmem:[#allocation13 + $0x18] sm:$0xff]  }
  0x72   :  { %788 = vmatprep.subr.bf16.mxu1 %v1104_v5 }
  0x73   :  { %805 = vmatpush3.bf16.msra.mxu0 %v893_v52 }
  0x74   :  { %806 = vmatprep.subr.bf16.mxu0 %v1104_v5 }
  0x75   :  { %789 = vmatpush3.bf16.msra.mxu1 %v879_v12  ;;  %v901_v12 = vld [vmem:[#allocation13 + $0x10] sm:$0xff]  }
  0x76   :  { %814 = vmatprep.subr.bf16.mxu1 %v1104_v5 }
  0x77   :  { %807 = vmatpush3.bf16.msra.mxu0 %v894_v53 }
  0x78   :  { %808 = vmatprep.subr.bf16.mxu0 %v1104_v5 }
  0x7b   :  { %809 = vmatpush3.bf16.msra.mxu0 %v895_v54 }
  0x7c   :  { %834 = vmatprep.subr.bf16.mxu0 %v1104_v5 }
 0x11b   :  { %v188_v18 = vpop.f32.mrf.mxu0 }
 0x11c   :  { %v189_v28 = vadd.f32 %v188_v18, %v133_v27 }
 0x11d   :  { %v190_v19 = vpop.f32.mrf.mxu0 }
 0x11e   :  { %v191_v20 = vadd.f32 %v190_v19, %v137_v17  ;;  %v209_v32 = vsub.f32 %v189_v28, %v699_v29 }
 0x11f   :  { %v192_v21 = vpop.f32.mrf.mxu0 }
 0x120   :  { %v698_v22 = vmul.f32 -1.442695, %v191_v20  ;;  %v210_v35 = vmul.f32 %v209_v32, %v209_v32 }
 0x121   :  { %v193_v23 = vpop.f32.mrf.mxu0 }
 0x122   :  { %904 = vpow2.f32 %v698_v22  ;;  %v215_v38 = vmul.f32 %v700_v36, %v210_v35 }
 0x124   :  { %v216_v40 = vmul.f32 1.442695, %v215_v38 }
 0x12f   :  { %v905_v24 = vpop.eup %904 }
 0x130   :  { %v198_v25 = vadd.f32 1.0, %v905_v24 }
 0x132   :  { %906 = vrcp.f32 %v198_v25 }
 0x133   :  { %908 = vpow2.f32 %v216_v40 }
 0x13f   :  { %v907_v30 = vpop.eup %906 }
 0x140   :  { %v218_v33 = vpack.c.bf16 %v907_v30, %v907_v30  ;;  %v909_v45 = vpop.eup %908 }
 0x141   :  { %v333_v46 = vpack.c.bf16 %v909_v45, %v909_v45 }
 0x142   :  { %791 = vmatmul.mubr.bf16.vlgmr.msra.gmra.mxu1 %v218_v33 }
 0x143   :  { %815 = vmatpush3.bf16.msra.mxu1 %v880_v31  ;;  %830 = vmatprep.mubr.msk.bf16.mxu1 %vm1105_vm1, %v1104_v5 }
 0x144   :  { %816 = vmatprep.subr.bf16.mxu1 %v1104_v5 }
 0x147   :  { %817 = vmatpush3.bf16.msra.mxu1 %v881_v34 }
 0x148   :  { %818 = vmatprep.subr.bf16.mxu1 %v1104_v5 }
 0x14b   :  { %819 = vmatpush3.bf16.msra.mxu1 %v882_v37 }
 0x14c   :  { %820 = vmatprep.subr.bf16.mxu1 %v1104_v5 }
 0x14f   :  { %821 = vmatpush3.bf16.msra.mxu1 %v883_v39 }
 0x150   :  { %822 = vmatprep.subr.bf16.mxu1 %v1104_v5 }
 0x153   :  { %823 = vmatpush3.bf16.msra.mxu1 %v884_v41 }
 0x154   :  { %824 = vmatprep.subr.bf16.mxu1 %v1104_v5 }
 0x157   :  { %825 = vmatpush3.bf16.msra.mxu1 %v885_v42 }
 0x158   :  { %826 = vmatprep.subr.bf16.mxu1 %v1104_v5 }
 0x15b   :  { %827 = vmatpush3.bf16.msra.mxu1 %v886_v43 }
 0x15c   :  { %828 = vmatprep.subr.bf16.mxu1 %v1104_v5 }
 0x15f   :  { %829 = vmatpush3.bf16.msra.mxu1 %v887_v44 }
 0x162   :  { %831 = vmatmul.mubr.bf16.vlgmr.msra.gmra.mxu1 %v333_v46 }
 0x202   :  { %v321_v56 = vpop.f32.mrf.mxu1 }
 0x203   :  { %v322_v57 = vadd.f32 %v701_v55, %v321_v56 }
 0x204   :  { %v792_v58 = vpop.f32.mrf.mxu1 }
 0x205   :  { %v710_v59 = vmul.f32 -1.442695, %v322_v57 }
 0x206   :  { %v324_v60 = vpop.f32.mrf.mxu1 }
 0x207   :  { %910 = vpow2.f32 %v710_v59 }
 0x208   :  { %v793_v61 = vpop.f32.mrf.mxu1 }
 0x214   :  { %v911_v62 = vpop.eup %910 }
 0x215   :  { %v330_v63 = vadd.f32 1.0, %v911_v62 }
 0x217   :  { %912 = vrcp.f32 %v330_v63 }
 0x222   :  { %v537_v0 = vpop.f32.mrf.mxu1 }
 0x224   :  { %v913_v1 = vpop.eup %912  ;;  %v832_v2 = vpop.f32.mrf.mxu1 }
 0x225   :  { %v350_v3 = vpack.c.bf16 %v913_v1, %v913_v1 }
 0x226   :  { %v540_v4 = vpop.f32.mrf.mxu1 }
 0x227   :  { %811 = vmatmul.mubr.bf16.vlgmr.msra.gmra.mxu0 %v350_v3 }
 0x228   :  { %v833_v6 = vpop.f32.mrf.mxu1  ;;  %850 = vmatprep.mubr.msk.bf16.mxu0 %vm1105_vm1, %v1104_v5  ;;  %835 = vmatpush3.bf16.msra.mxu0 %v896_v7 }
 0x229   :  { %836 = vmatprep.subr.bf16.mxu0 %v1104_v5 }
 0x22c   :  { %837 = vmatpush3.bf16.msra.mxu0 %v897_v8 }
 0x22d   :  { %838 = vmatprep.subr.bf16.mxu0 %v1104_v5 }
 0x230   :  { %839 = vmatpush3.bf16.msra.mxu0 %v898_v9 }
 0x231   :  { %840 = vmatprep.subr.bf16.mxu0 %v1104_v5 }
 0x234   :  { %841 = vmatpush3.bf16.msra.mxu0 %v899_v10 }
 0x235   :  { %842 = vmatprep.subr.bf16.mxu0 %v1104_v5 }
 0x238   :  { %843 = vmatpush3.bf16.msra.mxu0 %v900_v11 }
 0x239   :  { %844 = vmatprep.subr.bf16.mxu0 %v1104_v5 }
 0x23c   :  { %845 = vmatpush3.bf16.msra.mxu0 %v901_v12 }
 0x23d   :  { %846 = vmatprep.subr.bf16.mxu0 %v1104_v5 }
 0x240   :  { %847 = vmatpush3.bf16.msra.mxu0 %v902_v13 }
 0x241   :  { %848 = vmatprep.subr.bf16.mxu0 %v1104_v5  ;;  %v729_v5 = vld [vmem:[%s1247_s8] ss:$0 sm:$0xff]  ;;  %s1062_s8 = scalar_lea.vmem %s684_s23, 128 }
 0x242   :  { %p1063_p7 = scmp.ne.s32.totalorder %s684_s23, %s1062_s8  ;;  %p1068_p9 = scmp.lt.s32.totalorder %s1062_s8, %s1062_s8 }
 0x244   :  { %849 = vmatpush3.bf16.msra.mxu0 %v903_v14  ;;  %p1069_p10 = por %p1068_p9, %p1067_p8 }
 0x246   :  { %p1070_p11 = pnand %p1069_p10, %p1063_p7 }
 0x2e7   :  { %v449_v16 = vpop.f32.mrf.mxu0 }
 0x2e8   :  { %v538_v17 = vadd.f32 %v537_v0, %v449_v16 }
 0x2e9   :  { %v812_v18 = vpop.f32.mrf.mxu0 }
 0x2ea   :  { %v547_v19 = vadd.f32 %v727_v15, %v538_v17 }
 0x2eb   :  { %v452_v20 = vpop.f32.mrf.mxu0 }
 0x2ec   :  { %v728_v21 = vmul.f32 -1.442695, %v547_v19 }
 0x2ed   :  { %v813_v22 = vpop.f32.mrf.mxu0 }
 0x2ee   :  { %914 = vpow2.f32 %v728_v21 }
 0x2fb   :  { %v915_v23 = vpop.eup %914 }
 0x2fc   :  { %v551_v24 = vadd.f32 1.0, %v915_v23 }
 0x2fe   :  { %916 = vrcp.f32 %v551_v24 }
 0x30b   :  { %v917_v25 = vpop.eup %916 }
 0x30c   :  { %v554_v26 = vpack.c.bf16 %v917_v25, %v917_v25 }
 0x30e   :  { %851 = vmatmul.mubr.bf16.vlgmr.msra.gmra.mxu0 %v554_v26 }
 0x3ce   :  { %v660_v27 = vpop.f32.mrf.mxu0 }
 0x3cf   :  { %v661_v28 = vadd.f32 %v729_v5, %v660_v27 }
 0x3d0   :  { %v852_v29 = vpop.f32.mrf.mxu0 }
 0x3d1   :  { %666 = vmax.xlane.f32.xlu0 %v661_v28 }
 0x3d2   :  { %v663_v30 = vpop.f32.mrf.mxu0 }
 0x3d4   :  { %v853_v31 = vpop.f32.mrf.mxu0 }
 0x45a   :  { %v667_v32 = vpop.xlane.xlu0 %666 }
 0x45b   :  { %v668_v33 = vsub.f32 %v661_v28, %v667_v32 }
 0x45d   :  { %v669_v34 = vmul.f32 1.442695, %v668_v33 }
 0x45f   :  { %918 = vpow2.f32 %v669_v34 }
 0x46c   :  { %v919_v35 = vpop.eup %918 }
 0x46d   :  { %671 = vadd.xlane.f32.xlu0 %v919_v35 }
 0x4f6   :  { %v672_v36 = vpop.xlane.xlu0 %671 }
 0x4f7   :  { %920 = vlog2.f32 %v672_v36 }
 0x504   :  { %v921_v37 = vpop.eup %920 }
 0x505   :  { %v674_v38 = vmul.f32 0.6931472, %v921_v37 }
 0x507   :  { %v675_v39 = vsub.f32 %v668_v33, %v674_v38 }
 0x509   :  { %676 = vst [vmem:[#allocation14] sm:$0xff] %v675_v39 }
 0x50a   :  { %1073 = shalt.err (!%p1070_p11)
}
 0x50b   :  { %686 = dma.vmem_to_hbm [thread:$0]  %s684_s23, 128, %s1248_s9, [#allocation4]  }
 0x50c   :  { %1090 = dma.done.wait [#allocation4], 128  }
 0x50d   :  { %1091 = vsyncadd [#allocation4], 4294967168 }
 0x50e   :  { %690 = vsyncpa [#allocation3], 1 }
 0x50f   :  { %691 = vsyncpa [#allocation6], 1 }
 0x510   :  { %692 = vsyncpa [#allocation9], 1 }
 0x511   :  { %693 = vsyncpa [#allocation12], 1 }
 0x512   :  { %694 = vsyncpa [#allocation4], 1 }

</bundles_post_ra>
